<compile_context>
chip_gen: v7x
topology: tpu7x:2x2x1
jax: 0.10.0
libtpu: 0.0.40
codegen_flags: <defaults>
</compile_context>

<pallas_src>
import numpy as np
import jax
import jax.numpy as jnp
from jax import lax
from jax.experimental import pallas as pl
from jax.experimental.pallas import tpu as pltpu


# ---------------------------------------------------------------------------
# Fused RadarDecoder kernel (one batch element per grid step)
# ---------------------------------------------------------------------------
def _radar_decoder_kernel(x_ref, w1d1_ref, w21_ref, w1d2_ref, w22_ref,
                          ah_ref, bw_ref, alpha_ref, o_ref,
                          pad_in_ref, pad_mid_ref):
    # x_ref     : (1, Cin, H, W)         f32   one NCHW batch element
    # w1d1_ref  : (3, Cin*W, 2*Cout*W)   bf16  block1 conv1 || residual conv
    # w21_ref   : (3, Cout*W, Cout*W)    bf16  block1 conv2
    # w1d2_ref  : (3, Cout*W, 2*Cout*W)  bf16  block2 conv1 || residual conv
    # w22_ref   : (3, Cout*W, Cout*W)    bf16  block2 conv2
    # ah_ref    : (2H, H)                bf16  H-direction bilinear interp
    # bw_ref    : (Cout*W, Cout*2W)      bf16  W-direction interp = kron(I_C, Aw^T)
    # alpha_ref : (4,) f32 SMEM          PReLU slopes [b1_a1, b1_a2, b2_a1, b2_a2]
    # o_ref     : (1, Cout, 2H, 2W)      NCHW output block
    # pad_*_ref : (H+4, C*W) bf16 VMEM   zero-halo activations, channel-major lanes
    _, Cin, H, W = x_ref.shape
    Cout = o_ref.shape[1]
    Li = Cin * W
    Lm = Cout * W
    f32, bf16 = jnp.float32, jnp.bfloat16

    def conv(pad_ref, w_ref):
        # 3x3 conv = three accumulating MXU dots against the ky row-blocks of
        # the banded RHS (x taps + x zero-padding are folded into the band).
        # Scratch is already bf16, so the LHS needs no cast and no im2col slab.
        acc = jnp.dot(pad_ref[1:H + 1, :], w_ref[0], preferred_element_type=f32)
        acc = acc + jnp.dot(pad_ref[2:H + 2, :], w_ref[1], preferred_element_type=f32)
        acc = acc + jnp.dot(pad_ref[3:H + 3, :], w_ref[2], preferred_element_type=f32)
        return acc

    def prelu(v, a):
        return jnp.where(v > 0, v, a * v)

    # Zero the 2-row halos every step (cheap; correct under megacore splitting
    # of the parallel batch axis).  Interiors are fully overwritten before use.
    pad_in_ref[0:2, :] = jnp.zeros((2, Li), bf16)
    pad_in_ref[H + 2:H + 4, :] = jnp.zeros((2, Li), bf16)
    pad_mid_ref[0:2, :] = jnp.zeros((2, Lm), bf16)
    pad_mid_ref[H + 2:H + 4, :] = jnp.zeros((2, Lm), bf16)

    a11, a12 = alpha_ref[0], alpha_ref[1]
    a21, a22 = alpha_ref[2], alpha_ref[3]

    # ---- NCHW -> channel-major lane layout, folded into the kernel ----------
    for ci in range(Cin):
        pad_in_ref[2:H + 2, ci * W:(ci + 1) * W] = x_ref[0, ci, :, :].astype(bf16)

    # ---- block 1: conv1 || residual ("downsample") share one banded RHS -----
    t = conv(pad_in_ref, w1d1_ref)                       # (H, 2*Lm) f32
    y1 = prelu(t[:, :Lm], a11)
    r1 = t[:, Lm:]
    pad_mid_ref[2:H + 2, :] = y1.astype(bf16)
    b1 = prelu(conv(pad_mid_ref, w21_ref) + r1, a12)     # (H, Lm) f32

    # ---- block 2 -------------------------------------------------------------
    pad_mid_ref[2:H + 2, :] = b1.astype(bf16)
    t2 = conv(pad_mid_ref, w1d2_ref)                     # (H, 2*Lm)
    y2 = prelu(t2[:, :Lm], a21)
    r2 = t2[:, Lm:]
    pad_mid_ref[2:H + 2, :] = y2.astype(bf16)
    b2 = prelu(conv(pad_mid_ref, w22_ref) + r2, a22)     # (H, Lm)

    # ---- bilinear x2 upsample, align_corners=True (separable) ---------------
    xh = jnp.dot(ah_ref[...], b2.astype(bf16), preferred_element_type=f32)   # (2H, Lm)
    up = jnp.dot(xh.astype(bf16), bw_ref[...], preferred_element_type=f32)   # (2H, Cout*2W)

    # ---- channel-major lanes -> NCHW store (per-channel lane-block slices) --
    for co in range(Cout):
        o_ref[0, co, :, :] = up[:, co * 2 * W:(co + 1) * 2 * W].astype(o_ref.dtype)


# ---------------------------------------------------------------------------
# Host-side weight preparation (per-ky banded conv matrices, interp matrices)
# ---------------------------------------------------------------------------
def _conv3x3_to_banded(w, W):
    """torch conv weight (Cout, Cin, 3, 3) -> (3, Cin*W, Cout*W).

    Per-ky banded matrix acting on channel-major lanes (lane = c*W + x); the
    band encodes the x taps and the x-direction zero padding.  Row index
    (within a ky block) = ci*W + xi, column index = co*W + xo.
    """
    w = np.asarray(w, np.float32)
    Cout, Cin = w.shape[0], w.shape[1]
    M = np.zeros((3, Cin, W, Cout, W), np.float32)
    for ky in range(3):
        for kx in range(3):
            for xo in range(W):
                xi = xo + kx - 1
                if 0 <= xi < W:
                    M[ky, :, xi, :, xo] += w[:, :, ky, kx].T
    return M.reshape(3, Cin * W, Cout * W)


def _interp_matrix_np(n_in, n_out):
    """1-D linear interp matrix matching torch bilinear align_corners=True."""
    A = np.zeros((n_out, n_in), np.float32)
    if n_in == 1 or n_out == 1:
        A[:, 0] = 1.0
        return A
    scale = (n_in - 1) / (n_out - 1)
    for i in range(n_out):
        src = i * scale
        h0 = min(int(np.floor(src)), n_in - 1)
        h1 = min(h0 + 1, n_in - 1)
        f = src - h0
        A[i, h0] += 1.0 - f
        A[i, h1] += f
    return A


def prepare_params(p, H, W):
    """Build bf16 matmul operands once (hoisted out of the forward).

    Only (Cin, Cout, H, W) are baked in; batch is a grid axis, so there is no
    N-dependent kron matrix any more.
    """
    Cout, Cin = p['b1_w1'].shape[0], p['b1_w1'].shape[1]
    bf16 = jnp.bfloat16

    w1d1 = np.concatenate([_conv3x3_to_banded(p['b1_w1'], W),
                           _conv3x3_to_banded(p['b1_wd'], W)], axis=2)
    w21 = _conv3x3_to_banded(p['b1_w2'], W)
    w1d2 = np.concatenate([_conv3x3_to_banded(p['b2_w1'], W),
                           _conv3x3_to_banded(p['b2_wd'], W)], axis=2)
    w22 = _conv3x3_to_banded(p['b2_w2'], W)

    Ah = _interp_matrix_np(H, 2 * H)                        # (2H, H)
    Aw = _interp_matrix_np(W, 2 * W)                        # (2W, W)
    bw = np.kron(np.eye(Cout, dtype=np.float32), Aw.T)      # (Cout*W, Cout*2W)

    alphas = jnp.concatenate(
        [p['b1_a1'], p['b1_a2'], p['b2_a1'], p['b2_a2']]).astype(jnp.float32)

    return {
        'w1d1': jnp.asarray(w1d1, bf16), 'w21': jnp.asarray(w21, bf16),
        'w1d2': jnp.asarray(w1d2, bf16), 'w22': jnp.asarray(w22, bf16),
        'ah': jnp.asarray(Ah, bf16), 'bw': jnp.asarray(bw, bf16),
        'alphas': alphas,
        'Cin': int(Cin), 'Cout': int(Cout), 'H': int(H), 'W': int(W),
    }


# ---------------------------------------------------------------------------
# Full RadarDecoder forward (NCHW in / NCHW out, no host-side relayout)
# ---------------------------------------------------------------------------
def radar_decoder_forward(x_nchw, prep, out_dtype=jnp.float32):
    N, Cin, H, W = x_nchw.shape
    Cout = prep['Cout']
    # The prepared banded/interp matrices bake in (Cin, H, W): guard against a
    # silent geometry mismatch (review correctness concern).
    assert (Cin, H, W) == (prep['Cin'], prep['H'], prep['W']), \
        ((Cin, H, W), (prep['Cin'], prep['H'], prep['W']))

    grid_spec = pltpu.PrefetchScalarGridSpec(
        num_scalar_prefetch=0,
        grid=(N,),   # one batch element per step; parallel -> both v7x TCs busy
        in_specs=[
            pl.BlockSpec((1, Cin, H, W), lambda n: (n, 0, 0, 0)),
            # Weights: constant index_map -> stay resident in VMEM, no re-DMA
            # across grid steps (pl.Buffered(1) only matters once they're big).
            pl.BlockSpec(prep['w1d1'].shape, lambda n: (0, 0, 0)),
            pl.BlockSpec(prep['w21'].shape, lambda n: (0, 0, 0)),
            pl.BlockSpec(prep['w1d2'].shape, lambda n: (0, 0, 0)),
            pl.BlockSpec(prep['w22'].shape, lambda n: (0, 0, 0)),
            pl.BlockSpec(prep['ah'].shape, lambda n: (0, 0)),
            pl.BlockSpec(prep['bw'].shape, lambda n: (0, 0)),
            pl.BlockSpec(memory_space=pltpu.MemorySpace.SMEM),
        ],
        out_specs=pl.BlockSpec((1, Cout, 2 * H, 2 * W), lambda n: (n, 0, 0, 0)),
        scratch_shapes=[
            pltpu.VMEM((H + 4, Cin * W), jnp.bfloat16),    # zero-halo input
            pltpu.VMEM((H + 4, Cout * W), jnp.bfloat16),   # zero-halo intermediates
        ],
    )
    return pl.pallas_call(
        _radar_decoder_kernel,
        out_shape=jax.ShapeDtypeStruct((N, Cout, 2 * H, 2 * W), out_dtype),
        grid_spec=grid_spec,
        compiler_params=pltpu.CompilerParams(
            dimension_semantics=("parallel",)),
    )(x_nchw.astype(jnp.float32), prep['w1d1'], prep['w21'], prep['w1d2'],
      prep['w22'], prep['ah'], prep['bw'], prep['alphas'])


# ---------------------------------------------------------------------------
# Parameters (torch-layout conv weights + PReLU slopes)
# ---------------------------------------------------------------------------
def init_params(key, in_ch, out_ch):
    def conv_w(k, o, i):
        fan_in = i * 9
        return jax.random.normal(k, (o, i, 3, 3), jnp.float32) / np.sqrt(fan_in)

    ks = jax.random.split(key, 6)
    return {
        'b1_w1': conv_w(ks[0], out_ch, in_ch),
        'b1_w2': conv_w(ks[1], out_ch, out_ch),
        'b1_wd': conv_w(ks[2], out_ch, in_ch),
        'b1_a1': jnp.full((1,), 0.25, jnp.float32),   # nn.PReLU() default init
        'b1_a2': jnp.full((1,), 0.25, jnp.float32),
        'b2_w1': conv_w(ks[3], out_ch, out_ch),
        'b2_w2': conv_w(ks[4], out_ch, out_ch),
        'b2_wd': conv_w(ks[5], out_ch, out_ch),
        'b2_a1': jnp.full((1,), 0.25, jnp.float32),
        'b2_a2': jnp.full((1,), 0.25, jnp.float32),
    }


# ---------------------------------------------------------------------------
# Pure-JAX high-precision reference (for verification)
# ---------------------------------------------------------------------------
def _conv_ref(x, w):
    return lax.conv_general_dilated(
        x, w, (1, 1), ((1, 1), (1, 1)),
        dimension_numbers=('NCHW', 'OIHW', 'NCHW'),
        precision=lax.Precision.HIGHEST)


def _prelu_ref(x, a):
    return jnp.where(x > 0, x, a * x)


def _block_ref(x, w1, w2, wd, a1, a2):
    y = _conv_ref(x, w1)
    y = _prelu_ref(y, a1[0])
    y = _conv_ref(y, w2)
    r = _conv_ref(x, wd)
    return _prelu_ref(y + r, a2[0])


def radar_decoder_ref(x, p):
    x = _block_ref(x, p['b1_w1'], p['b1_w2'], p['b1_wd'], p['b1_a1'], p['b1_a2'])
    x = _block_ref(x, p['b2_w1'], p['b2_w2'], p['b2_wd'], p['b2_a1'], p['b2_a2'])
    N, C, H, W = x.shape
    Ah = jnp.asarray(_interp_matrix_np(H, 2 * H))
    Aw = jnp.asarray(_interp_matrix_np(W, 2 * W))
    return jnp.einsum('ih,jw,nchw->ncij', Ah, Aw, x,
                      precision=lax.Precision.HIGHEST)


if __name__ == "__main__":
    key = jax.random.PRNGKey(0)
    k_x, k_p = jax.random.split(key)

    N, in_ch, out_ch, H, W = 2, 4, 16, 16, 16
    N, in_ch, out_ch, H, W = 2, 4, 8, 16, 16
    x = jax.random.normal(k_x, (N, in_ch, H, W), jnp.float32)
    params = init_params(k_p, in_ch, out_ch)

    prep = prepare_params(params, H, W)
    fwd = jax.jit(lambda xx: radar_decoder_forward(xx, prep))
    out = jax.block_until_ready(fwd(x))
    assert out.shape == (N, out_ch, 2 * H, 2 * W), out.shape

    ref = jax.block_until_ready(radar_decoder_ref(x, params))
    # bf16 MXU operands (f32 accumulation) -> same error class as before.
    rel_err = float(jnp.max(jnp.abs(out - ref)) / (jnp.max(jnp.abs(ref)) + 1e-6))
    assert rel_err < 2e-2, f"relative error too large: {rel_err}"

    print("KERNEL_OK")
</pallas_src>

<mosaic_0001>
module attributes {stable_mosaic.version = 11 : i64} {
  func.func @_radar_decoder_kernel(%arg0: i32, %arg1: memref<1x4x16x16xf32, #tpu.memory_space<vmem>>, %arg2: memref<3x64x256xbf16, #tpu.memory_space<vmem>>, %arg3: memref<3x128x128xbf16, #tpu.memory_space<vmem>>, %arg4: memref<3x128x256xbf16, #tpu.memory_space<vmem>>, %arg5: memref<3x128x128xbf16, #tpu.memory_space<vmem>>, %arg6: memref<32x16xbf16, #tpu.memory_space<vmem>>, %arg7: memref<128x256xbf16, #tpu.memory_space<vmem>>, %arg8: memref<4xf32, #tpu.memory_space<smem>>, %arg9: memref<1x8x32x32xf32, #tpu.memory_space<vmem>>, %arg10: memref<20x64xbf16, #tpu.memory_space<vmem>>, %arg11: memref<20x128xbf16, #tpu.memory_space<vmem>>) attributes {dimension_semantics = [#tpu.dimension_semantics<parallel>], iteration_bounds = array<i64: 2>, scalar_prefetch = 0 : i64, scratch_operands = 2 : i64, tpu.core_type = #tpu.core_type<tc>, window_params = [{transform_indices = @transform_0, window_bounds = array<i64: 1, 4, 16, 16>}, {pipeline_mode = #tpu.pipeline_mode<synchronous>, transform_indices = @transform_1, window_bounds = array<i64: 3, 64, 256>}, {pipeline_mode = #tpu.pipeline_mode<synchronous>, transform_indices = @transform_2, window_bounds = array<i64: 3, 128, 128>}, {pipeline_mode = #tpu.pipeline_mode<synchronous>, transform_indices = @transform_3, window_bounds = array<i64: 3, 128, 256>}, {pipeline_mode = #tpu.pipeline_mode<synchronous>, transform_indices = @transform_4, window_bounds = array<i64: 3, 128, 128>}, {pipeline_mode = #tpu.pipeline_mode<synchronous>, transform_indices = @transform_5, window_bounds = array<i64: 32, 16>}, {pipeline_mode = #tpu.pipeline_mode<synchronous>, transform_indices = @transform_6, window_bounds = array<i64: 128, 256>}, {transform_indices = @transform_7, window_bounds = array<i64: 4>}, {transform_indices = @transform_8, window_bounds = array<i64: 1, 8, 32, 32>}]} {
    %cst = arith.constant 0.000000e+00 : bf16
    %0 = vector.broadcast %cst : bf16 to vector<2x64xbf16>
    %c0 = arith.constant 0 : index
    %c0_0 = arith.constant 0 : index
    %1 = vector.load %arg10[%c0, %c0_0] : memref<20x64xbf16, #tpu.memory_space<vmem>>, vector<2x64xbf16>
    tpu.vector_store %arg10[%c0, %c0_0], %0 {strides = array<i32>} : memref<20x64xbf16, #tpu.memory_space<vmem>>, vector<2x64xbf16>,
    %cst_1 = arith.constant 0.000000e+00 : bf16
    %2 = vector.broadcast %cst_1 : bf16 to vector<2x64xbf16>
    %c18 = arith.constant 18 : index
    %c0_2 = arith.constant 0 : index
    %3 = vector.load %arg10[%c18, %c0_2] : memref<20x64xbf16, #tpu.memory_space<vmem>>, vector<2x64xbf16>
    tpu.vector_store %arg10[%c18, %c0_2], %2 {strides = array<i32>} : memref<20x64xbf16, #tpu.memory_space<vmem>>, vector<2x64xbf16>,
    %cst_3 = arith.constant 0.000000e+00 : bf16
    %4 = vector.broadcast %cst_3 : bf16 to vector<2x128xbf16>
    %c0_4 = arith.constant 0 : index
    %c0_5 = arith.constant 0 : index
    %5 = vector.load %arg11[%c0_4, %c0_5] : memref<20x128xbf16, #tpu.memory_space<vmem>>, vector<2x128xbf16>
    tpu.vector_store %arg11[%c0_4, %c0_5], %4 {strides = array<i32>} : memref<20x128xbf16, #tpu.memory_space<vmem>>, vector<2x128xbf16>,
    %cst_6 = arith.constant 0.000000e+00 : bf16
    %6 = vector.broadcast %cst_6 : bf16 to vector<2x128xbf16>
    %c18_7 = arith.constant 18 : index
    %c0_8 = arith.constant 0 : index
    %7 = vector.load %arg11[%c18_7, %c0_8] : memref<20x128xbf16, #tpu.memory_space<vmem>>, vector<2x128xbf16>
    tpu.vector_store %arg11[%c18_7, %c0_8], %6 {strides = array<i32>} : memref<20x128xbf16, #tpu.memory_space<vmem>>, vector<2x128xbf16>,
    %c0_9 = arith.constant 0 : index
    %8 = memref.load %arg8[%c0_9] : memref<4xf32, #tpu.memory_space<smem>>
    %c1 = arith.constant 1 : index
    %9 = memref.load %arg8[%c1] : memref<4xf32, #tpu.memory_space<smem>>
    %c2 = arith.constant 2 : index
    %10 = memref.load %arg8[%c2] : memref<4xf32, #tpu.memory_space<smem>>
    %c3 = arith.constant 3 : index
    %11 = memref.load %arg8[%c3] : memref<4xf32, #tpu.memory_space<smem>>
    %c0_10 = arith.constant 0 : index
    %c0_11 = arith.constant 0 : index
    %c0_12 = arith.constant 0 : index
    %c0_13 = arith.constant 0 : index
    %12 = vector.load %arg1[%c0_10, %c0_11, %c0_12, %c0_13] : memref<1x4x16x16xf32, #tpu.memory_space<vmem>>, vector<1x1x16x16xf32>
    %13 = vector.shape_cast %12 : vector<1x1x16x16xf32> to vector<16x16xf32>
    %14 = arith.truncf %13 : vector<16x16xf32> to vector<16x16xbf16>
    %c2_14 = arith.constant 2 : index
    %c0_15 = arith.constant 0 : index
    %15 = vector.load %arg10[%c2_14, %c0_15] : memref<20x64xbf16, #tpu.memory_space<vmem>>, vector<16x16xbf16>
    tpu.vector_store %arg10[%c2_14, %c0_15], %14 {strides = array<i32>} : memref<20x64xbf16, #tpu.memory_space<vmem>>, vector<16x16xbf16>,
    %c0_16 = arith.constant 0 : index
    %c1_17 = arith.constant 1 : index
    %c0_18 = arith.constant 0 : index
    %c0_19 = arith.constant 0 : index
    %16 = vector.load %arg1[%c0_16, %c1_17, %c0_18, %c0_19] : memref<1x4x16x16xf32, #tpu.memory_space<vmem>>, vector<1x1x16x16xf32>
    %17 = vector.shape_cast %16 : vector<1x1x16x16xf32> to vector<16x16xf32>
    %18 = arith.truncf %17 : vector<16x16xf32> to vector<16x16xbf16>
    %c2_20 = arith.constant 2 : index
    %c16 = arith.constant 16 : index
    %19 = vector.load %arg10[%c2_20, %c16] : memref<20x64xbf16, #tpu.memory_space<vmem>>, vector<16x16xbf16>
    tpu.vector_store %arg10[%c2_20, %c16], %18 {strides = array<i32>} : memref<20x64xbf16, #tpu.memory_space<vmem>>, vector<16x16xbf16>,
    %c0_21 = arith.constant 0 : index
    %c2_22 = arith.constant 2 : index
    %c0_23 = arith.constant 0 : index
    %c0_24 = arith.constant 0 : index
    %20 = vector.load %arg1[%c0_21, %c2_22, %c0_23, %c0_24] : memref<1x4x16x16xf32, #tpu.memory_space<vmem>>, vector<1x1x16x16xf32>
    %21 = vector.shape_cast %20 : vector<1x1x16x16xf32> to vector<16x16xf32>
    %22 = arith.truncf %21 : vector<16x16xf32> to vector<16x16xbf16>
    %c2_25 = arith.constant 2 : index
    %c32 = arith.constant 32 : index
    %23 = vector.load %arg10[%c2_25, %c32] : memref<20x64xbf16, #tpu.memory_space<vmem>>, vector<16x16xbf16>
    tpu.vector_store %arg10[%c2_25, %c32], %22 {strides = array<i32>} : memref<20x64xbf16, #tpu.memory_space<vmem>>, vector<16x16xbf16>,
    %c0_26 = arith.constant 0 : index
    %c3_27 = arith.constant 3 : index
    %c0_28 = arith.constant 0 : index
    %c0_29 = arith.constant 0 : index
    %24 = vector.load %arg1[%c0_26, %c3_27, %c0_28, %c0_29] : memref<1x4x16x16xf32, #tpu.memory_space<vmem>>, vector<1x1x16x16xf32>
    %25 = vector.shape_cast %24 : vector<1x1x16x16xf32> to vector<16x16xf32>
    %26 = arith.truncf %25 : vector<16x16xf32> to vector<16x16xbf16>
    %c2_30 = arith.constant 2 : index
    %c48 = arith.constant 48 : index
    %27 = vector.load %arg10[%c2_30, %c48] : memref<20x64xbf16, #tpu.memory_space<vmem>>, vector<16x16xbf16>
    tpu.vector_store %arg10[%c2_30, %c48], %26 {strides = array<i32>} : memref<20x64xbf16, #tpu.memory_space<vmem>>, vector<16x16xbf16>,
    %c1_31 = arith.constant 1 : index
    %c0_32 = arith.constant 0 : index
    %28 = vector.load %arg10[%c1_31, %c0_32] : memref<20x64xbf16, #tpu.memory_space<vmem>>, vector<16x64xbf16>
    %c0_33 = arith.constant 0 : index
    %c0_34 = arith.constant 0 : index
    %c0_35 = arith.constant 0 : index
    %29 = vector.load %arg2[%c0_33, %c0_34, %c0_35] : memref<3x64x256xbf16, #tpu.memory_space<vmem>>, vector<1x64x256xbf16>
    %30 = vector.shape_cast %29 : vector<1x64x256xbf16> to vector<64x256xbf16>
    %cst_36 = arith.constant dense<0.000000e+00> : vector<16x256xf32>
    %31 = tpu.matmul %28, %30, %cst_36 {dimension_numbers = #tpu.dot_dimension_numbers<[1], [0], [0], [1], [0, 0, 1, 1], [], []>} : vector<16x64xbf16>, vector<64x256xbf16>, vector<16x256xf32> -> vector<16x256xf32>
    %c2_37 = arith.constant 2 : index
    %c0_38 = arith.constant 0 : index
    %32 = vector.load %arg10[%c2_37, %c0_38] : memref<20x64xbf16, #tpu.memory_space<vmem>>, vector<16x64xbf16>
    %c1_39 = arith.constant 1 : index
    %c0_40 = arith.constant 0 : index
    %c0_41 = arith.constant 0 : index
    %33 = vector.load %arg2[%c1_39, %c0_40, %c0_41] : memref<3x64x256xbf16, #tpu.memory_space<vmem>>, vector<1x64x256xbf16>
    %34 = vector.shape_cast %33 : vector<1x64x256xbf16> to vector<64x256xbf16>
    %cst_42 = arith.constant dense<0.000000e+00> : vector<16x256xf32>
    %35 = tpu.matmul %32, %34, %cst_42 {dimension_numbers = #tpu.dot_dimension_numbers<[1], [0], [0], [1], [0, 0, 1, 1], [], []>} : vector<16x64xbf16>, vector<64x256xbf16>, vector<16x256xf32> -> vector<16x256xf32>
    %36 = arith.addf %31, %35 : vector<16x256xf32>
    %c3_43 = arith.constant 3 : index
    %c0_44 = arith.constant 0 : index
    %37 = vector.load %arg10[%c3_43, %c0_44] : memref<20x64xbf16, #tpu.memory_space<vmem>>, vector<16x64xbf16>
    %c2_45 = arith.constant 2 : index
    %c0_46 = arith.constant 0 : index
    %c0_47 = arith.constant 0 : index
    %38 = vector.load %arg2[%c2_45, %c0_46, %c0_47] : memref<3x64x256xbf16, #tpu.memory_space<vmem>>, vector<1x64x256xbf16>
    %39 = vector.shape_cast %38 : vector<1x64x256xbf16> to vector<64x256xbf16>
    %cst_48 = arith.constant dense<0.000000e+00> : vector<16x256xf32>
    %40 = tpu.matmul %37, %39, %cst_48 {dimension_numbers = #tpu.dot_dimension_numbers<[1], [0], [0], [1], [0, 0, 1, 1], [], []>} : vector<16x64xbf16>, vector<64x256xbf16>, vector<16x256xf32> -> vector<16x256xf32>
    %41 = arith.addf %36, %40 : vector<16x256xf32>
    %42 = vector.extract_strided_slice %41 {offsets = [0, 0], sizes = [16, 128], strides = [1, 1]} : vector<16x256xf32> to vector<16x128xf32>
    %cst_49 = arith.constant 0.000000e+00 : f32
    %43 = vector.broadcast %cst_49 : f32 to vector<16x128xf32>
    %44 = arith.cmpf ogt, %42, %43 : vector<16x128xf32>
    %45 = vector.broadcast %8 : f32 to vector<16x128xf32>
    %46 = arith.mulf %45, %42 : vector<16x128xf32>
    %47 = arith.select %44, %42, %46 : vector<16x128xi1>, vector<16x128xf32>
    %48 = vector.extract_strided_slice %41 {offsets = [0, 128], sizes = [16, 128], strides = [1, 1]} : vector<16x256xf32> to vector<16x128xf32>
    %49 = arith.truncf %47 : vector<16x128xf32> to vector<16x128xbf16>
    %c2_50 = arith.constant 2 : index
    %c0_51 = arith.constant 0 : index
    %50 = vector.load %arg11[%c2_50, %c0_51] : memref<20x128xbf16, #tpu.memory_space<vmem>>, vector<16x128xbf16>
    tpu.vector_store %arg11[%c2_50, %c0_51], %49 {strides = array<i32>} : memref<20x128xbf16, #tpu.memory_space<vmem>>, vector<16x128xbf16>,
    %c1_52 = arith.constant 1 : index
    %c0_53 = arith.constant 0 : index
    %51 = vector.load %arg11[%c1_52, %c0_53] : memref<20x128xbf16, #tpu.memory_space<vmem>>, vector<16x128xbf16>
    %c0_54 = arith.constant 0 : index
    %c0_55 = arith.constant 0 : index
    %c0_56 = arith.constant 0 : index
    %52 = vector.load %arg3[%c0_54, %c0_55, %c0_56] : memref<3x128x128xbf16, #tpu.memory_space<vmem>>, vector<1x128x128xbf16>
    %53 = vector.shape_cast %52 : vector<1x128x128xbf16> to vector<128x128xbf16>
    %cst_57 = arith.constant dense<0.000000e+00> : vector<16x128xf32>
    %54 = tpu.matmul %51, %53, %cst_57 {dimension_numbers = #tpu.dot_dimension_numbers<[1], [0], [0], [1], [0, 0, 1, 1], [], []>} : vector<16x128xbf16>, vector<128x128xbf16>, vector<16x128xf32> -> vector<16x128xf32>
    %c2_58 = arith.constant 2 : index
    %c0_59 = arith.constant 0 : index
    %55 = vector.load %arg11[%c2_58, %c0_59] : memref<20x128xbf16, #tpu.memory_space<vmem>>, vector<16x128xbf16>
    %c1_60 = arith.constant 1 : index
    %c0_61 = arith.constant 0 : index
    %c0_62 = arith.constant 0 : index
    %56 = vector.load %arg3[%c1_60, %c0_61, %c0_62] : memref<3x128x128xbf16, #tpu.memory_space<vmem>>, vector<1x128x128xbf16>
    %57 = vector.shape_cast %56 : vector<1x128x128xbf16> to vector<128x128xbf16>
    %cst_63 = arith.constant dense<0.000000e+00> : vector<16x128xf32>
    %58 = tpu.matmul %55, %57, %cst_63 {dimension_numbers = #tpu.dot_dimension_numbers<[1], [0], [0], [1], [0, 0, 1, 1], [], []>} : vector<16x128xbf16>, vector<128x128xbf16>, vector<16x128xf32> -> vector<16x128xf32>
    %59 = arith.addf %54, %58 : vector<16x128xf32>
    %c3_64 = arith.constant 3 : index
    %c0_65 = arith.constant 0 : index
    %60 = vector.load %arg11[%c3_64, %c0_65] : memref<20x128xbf16, #tpu.memory_space<vmem>>, vector<16x128xbf16>
    %c2_66 = arith.constant 2 : index
    %c0_67 = arith.constant 0 : index
    %c0_68 = arith.constant 0 : index
    %61 = vector.load %arg3[%c2_66, %c0_67, %c0_68] : memref<3x128x128xbf16, #tpu.memory_space<vmem>>, vector<1x128x128xbf16>
    %62 = vector.shape_cast %61 : vector<1x128x128xbf16> to vector<128x128xbf16>
    %cst_69 = arith.constant dense<0.000000e+00> : vector<16x128xf32>
    %63 = tpu.matmul %60, %62, %cst_69 {dimension_numbers = #tpu.dot_dimension_numbers<[1], [0], [0], [1], [0, 0, 1, 1], [], []>} : vector<16x128xbf16>, vector<128x128xbf16>, vector<16x128xf32> -> vector<16x128xf32>
    %64 = arith.addf %59, %63 : vector<16x128xf32>
    %65 = arith.addf %64, %48 : vector<16x128xf32>
    %cst_70 = arith.constant 0.000000e+00 : f32
    %66 = vector.broadcast %cst_70 : f32 to vector<16x128xf32>
    %67 = arith.cmpf ogt, %65, %66 : vector<16x128xf32>
    %68 = vector.broadcast %9 : f32 to vector<16x128xf32>
    %69 = arith.mulf %68, %65 : vector<16x128xf32>
    %70 = arith.select %67, %65, %69 : vector<16x128xi1>, vector<16x128xf32>
    %71 = arith.truncf %70 : vector<16x128xf32> to vector<16x128xbf16>
    %c2_71 = arith.constant 2 : index
    %c0_72 = arith.constant 0 : index
    %72 = vector.load %arg11[%c2_71, %c0_72] : memref<20x128xbf16, #tpu.memory_space<vmem>>, vector<16x128xbf16>
    tpu.vector_store %arg11[%c2_71, %c0_72], %71 {strides = array<i32>} : memref<20x128xbf16, #tpu.memory_space<vmem>>, vector<16x128xbf16>,
    %c1_73 = arith.constant 1 : index
    %c0_74 = arith.constant 0 : index
    %73 = vector.load %arg11[%c1_73, %c0_74] : memref<20x128xbf16, #tpu.memory_space<vmem>>, vector<16x128xbf16>
    %c0_75 = arith.constant 0 : index
    %c0_76 = arith.constant 0 : index
    %c0_77 = arith.constant 0 : index
    %74 = vector.load %arg4[%c0_75, %c0_76, %c0_77] : memref<3x128x256xbf16, #tpu.memory_space<vmem>>, vector<1x128x256xbf16>
    %75 = vector.shape_cast %74 : vector<1x128x256xbf16> to vector<128x256xbf16>
    %cst_78 = arith.constant dense<0.000000e+00> : vector<16x256xf32>
    %76 = tpu.matmul %73, %75, %cst_78 {dimension_numbers = #tpu.dot_dimension_numbers<[1], [0], [0], [1], [0, 0, 1, 1], [], []>} : vector<16x128xbf16>, vector<128x256xbf16>, vector<16x256xf32> -> vector<16x256xf32>
    %c2_79 = arith.constant 2 : index
    %c0_80 = arith.constant 0 : index
    %77 = vector.load %arg11[%c2_79, %c0_80] : memref<20x128xbf16, #tpu.memory_space<vmem>>, vector<16x128xbf16>
    %c1_81 = arith.constant 1 : index
    %c0_82 = arith.constant 0 : index
    %c0_83 = arith.constant 0 : index
    %78 = vector.load %arg4[%c1_81, %c0_82, %c0_83] : memref<3x128x256xbf16, #tpu.memory_space<vmem>>, vector<1x128x256xbf16>
    %79 = vector.shape_cast %78 : vector<1x128x256xbf16> to vector<128x256xbf16>
    %cst_84 = arith.constant dense<0.000000e+00> : vector<16x256xf32>
    %80 = tpu.matmul %77, %79, %cst_84 {dimension_numbers = #tpu.dot_dimension_numbers<[1], [0], [0], [1], [0, 0, 1, 1], [], []>} : vector<16x128xbf16>, vector<128x256xbf16>, vector<16x256xf32> -> vector<16x256xf32>
    %81 = arith.addf %76, %80 : vector<16x256xf32>
    %c3_85 = arith.constant 3 : index
    %c0_86 = arith.constant 0 : index
    %82 = vector.load %arg11[%c3_85, %c0_86] : memref<20x128xbf16, #tpu.memory_space<vmem>>, vector<16x128xbf16>
    %c2_87 = arith.constant 2 : index
    %c0_88 = arith.constant 0 : index
    %c0_89 = arith.constant 0 : index
    %83 = vector.load %arg4[%c2_87, %c0_88, %c0_89] : memref<3x128x256xbf16, #tpu.memory_space<vmem>>, vector<1x128x256xbf16>
    %84 = vector.shape_cast %83 : vector<1x128x256xbf16> to vector<128x256xbf16>
    %cst_90 = arith.constant dense<0.000000e+00> : vector<16x256xf32>
    %85 = tpu.matmul %82, %84, %cst_90 {dimension_numbers = #tpu.dot_dimension_numbers<[1], [0], [0], [1], [0, 0, 1, 1], [], []>} : vector<16x128xbf16>, vector<128x256xbf16>, vector<16x256xf32> -> vector<16x256xf32>
    %86 = arith.addf %81, %85 : vector<16x256xf32>
    %87 = vector.extract_strided_slice %86 {offsets = [0, 0], sizes = [16, 128], strides = [1, 1]} : vector<16x256xf32> to vector<16x128xf32>
    %cst_91 = arith.constant 0.000000e+00 : f32
    %88 = vector.broadcast %cst_91 : f32 to vector<16x128xf32>
    %89 = arith.cmpf ogt, %87, %88 : vector<16x128xf32>
    %90 = vector.broadcast %10 : f32 to vector<16x128xf32>
    %91 = arith.mulf %90, %87 : vector<16x128xf32>
    %92 = arith.select %89, %87, %91 : vector<16x128xi1>, vector<16x128xf32>
    %93 = vector.extract_strided_slice %86 {offsets = [0, 128], sizes = [16, 128], strides = [1, 1]} : vector<16x256xf32> to vector<16x128xf32>
    %94 = arith.truncf %92 : vector<16x128xf32> to vector<16x128xbf16>
    %c2_92 = arith.constant 2 : index
    %c0_93 = arith.constant 0 : index
    %95 = vector.load %arg11[%c2_92, %c0_93] : memref<20x128xbf16, #tpu.memory_space<vmem>>, vector<16x128xbf16>
    tpu.vector_store %arg11[%c2_92, %c0_93], %94 {strides = array<i32>} : memref<20x128xbf16, #tpu.memory_space<vmem>>, vector<16x128xbf16>,
    %c1_94 = arith.constant 1 : index
    %c0_95 = arith.constant 0 : index
    %96 = vector.load %arg11[%c1_94, %c0_95] : memref<20x128xbf16, #tpu.memory_space<vmem>>, vector<16x128xbf16>
    %c0_96 = arith.constant 0 : index
    %c0_97 = arith.constant 0 : index
    %c0_98 = arith.constant 0 : index
    %97 = vector.load %arg5[%c0_96, %c0_97, %c0_98] : memref<3x128x128xbf16, #tpu.memory_space<vmem>>, vector<1x128x128xbf16>
    %98 = vector.shape_cast %97 : vector<1x128x128xbf16> to vector<128x128xbf16>
    %cst_99 = arith.constant dense<0.000000e+00> : vector<16x128xf32>
    %99 = tpu.matmul %96, %98, %cst_99 {dimension_numbers = #tpu.dot_dimension_numbers<[1], [0], [0], [1], [0, 0, 1, 1], [], []>} : vector<16x128xbf16>, vector<128x128xbf16>, vector<16x128xf32> -> vector<16x128xf32>
    %c2_100 = arith.constant 2 : index
    %c0_101 = arith.constant 0 : index
    %100 = vector.load %arg11[%c2_100, %c0_101] : memref<20x128xbf16, #tpu.memory_space<vmem>>, vector<16x128xbf16>
    %c1_102 = arith.constant 1 : index
    %c0_103 = arith.constant 0 : index
    %c0_104 = arith.constant 0 : index
    %101 = vector.load %arg5[%c1_102, %c0_103, %c0_104] : memref<3x128x128xbf16, #tpu.memory_space<vmem>>, vector<1x128x128xbf16>
    %102 = vector.shape_cast %101 : vector<1x128x128xbf16> to vector<128x128xbf16>
    %cst_105 = arith.constant dense<0.000000e+00> : vector<16x128xf32>
    %103 = tpu.matmul %100, %102, %cst_105 {dimension_numbers = #tpu.dot_dimension_numbers<[1], [0], [0], [1], [0, 0, 1, 1], [], []>} : vector<16x128xbf16>, vector<128x128xbf16>, vector<16x128xf32> -> vector<16x128xf32>
    %104 = arith.addf %99, %103 : vector<16x128xf32>
    %c3_106 = arith.constant 3 : index
    %c0_107 = arith.constant 0 : index
    %105 = vector.load %arg11[%c3_106, %c0_107] : memref<20x128xbf16, #tpu.memory_space<vmem>>, vector<16x128xbf16>
    %c2_108 = arith.constant 2 : index
    %c0_109 = arith.constant 0 : index
    %c0_110 = arith.constant 0 : index
    %106 = vector.load %arg5[%c2_108, %c0_109, %c0_110] : memref<3x128x128xbf16, #tpu.memory_space<vmem>>, vector<1x128x128xbf16>
    %107 = vector.shape_cast %106 : vector<1x128x128xbf16> to vector<128x128xbf16>
    %cst_111 = arith.constant dense<0.000000e+00> : vector<16x128xf32>
    %108 = tpu.matmul %105, %107, %cst_111 {dimension_numbers = #tpu.dot_dimension_numbers<[1], [0], [0], [1], [0, 0, 1, 1], [], []>} : vector<16x128xbf16>, vector<128x128xbf16>, vector<16x128xf32> -> vector<16x128xf32>
    %109 = arith.addf %104, %108 : vector<16x128xf32>
    %110 = arith.addf %109, %93 : vector<16x128xf32>
    %cst_112 = arith.constant 0.000000e+00 : f32
    %111 = vector.broadcast %cst_112 : f32 to vector<16x128xf32>
    %112 = arith.cmpf ogt, %110, %111 : vector<16x128xf32>
    %113 = vector.broadcast %11 : f32 to vector<16x128xf32>
    %114 = arith.mulf %113, %110 : vector<16x128xf32>
    %115 = arith.select %112, %110, %114 : vector<16x128xi1>, vector<16x128xf32>
    %c0_113 = arith.constant 0 : index
    %c0_114 = arith.constant 0 : index
    %116 = vector.load %arg6[%c0_113, %c0_114] : memref<32x16xbf16, #tpu.memory_space<vmem>>, vector<32x16xbf16>
    %117 = arith.truncf %115 : vector<16x128xf32> to vector<16x128xbf16>
    %cst_115 = arith.constant dense<0.000000e+00> : vector<32x128xf32>
    %118 = tpu.matmul %116, %117, %cst_115 {dimension_numbers = #tpu.dot_dimension_numbers<[1], [0], [0], [1], [0, 0, 1, 1], [], []>} : vector<32x16xbf16>, vector<16x128xbf16>, vector<32x128xf32> -> vector<32x128xf32>
    %119 = arith.truncf %118 : vector<32x128xf32> to vector<32x128xbf16>
    %c0_116 = arith.constant 0 : index
    %c0_117 = arith.constant 0 : index
    %120 = vector.load %arg7[%c0_116, %c0_117] : memref<128x256xbf16, #tpu.memory_space<vmem>>, vector<128x256xbf16>
    %cst_118 = arith.constant dense<0.000000e+00> : vector<32x256xf32>
    %121 = tpu.matmul %119, %120, %cst_118 {dimension_numbers = #tpu.dot_dimension_numbers<[1], [0], [0], [1], [0, 0, 1, 1], [], []>} : vector<32x128xbf16>, vector<128x256xbf16>, vector<32x256xf32> -> vector<32x256xf32>
    %122 = vector.extract_strided_slice %121 {offsets = [0, 0], sizes = [32, 32], strides = [1, 1]} : vector<32x256xf32> to vector<32x32xf32>
    %c0_119 = arith.constant 0 : index
    %c0_120 = arith.constant 0 : index
    %c0_121 = arith.constant 0 : index
    %c0_122 = arith.constant 0 : index
    %123 = vector.load %arg9[%c0_119, %c0_120, %c0_121, %c0_122] : memref<1x8x32x32xf32, #tpu.memory_space<vmem>>, vector<1x1x32x32xf32>
    %124 = vector.shape_cast %123 : vector<1x1x32x32xf32> to vector<32x32xf32>
    %125 = vector.shape_cast %122 : vector<32x32xf32> to vector<1x1x32x32xf32>
    tpu.vector_store %arg9[%c0_119, %c0_120, %c0_121, %c0_122], %125 {strides = array<i32>} : memref<1x8x32x32xf32, #tpu.memory_space<vmem>>, vector<1x1x32x32xf32>,
    %126 = vector.extract_strided_slice %121 {offsets = [0, 32], sizes = [32, 32], strides = [1, 1]} : vector<32x256xf32> to vector<32x32xf32>
    %c0_123 = arith.constant 0 : index
    %c1_124 = arith.constant 1 : index
    %c0_125 = arith.constant 0 : index
    %c0_126 = arith.constant 0 : index
    %127 = vector.load %arg9[%c0_123, %c1_124, %c0_125, %c0_126] : memref<1x8x32x32xf32, #tpu.memory_space<vmem>>, vector<1x1x32x32xf32>
    %128 = vector.shape_cast %127 : vector<1x1x32x32xf32> to vector<32x32xf32>
    %129 = vector.shape_cast %126 : vector<32x32xf32> to vector<1x1x32x32xf32>
    tpu.vector_store %arg9[%c0_123, %c1_124, %c0_125, %c0_126], %129 {strides = array<i32>} : memref<1x8x32x32xf32, #tpu.memory_space<vmem>>, vector<1x1x32x32xf32>,
    %130 = vector.extract_strided_slice %121 {offsets = [0, 64], sizes = [32, 32], strides = [1, 1]} : vector<32x256xf32> to vector<32x32xf32>
    %c0_127 = arith.constant 0 : index
    %c2_128 = arith.constant 2 : index
    %c0_129 = arith.constant 0 : index
    %c0_130 = arith.constant 0 : index
    %131 = vector.load %arg9[%c0_127, %c2_128, %c0_129, %c0_130] : memref<1x8x32x32xf32, #tpu.memory_space<vmem>>, vector<1x1x32x32xf32>
    %132 = vector.shape_cast %131 : vector<1x1x32x32xf32> to vector<32x32xf32>
    %133 = vector.shape_cast %130 : vector<32x32xf32> to vector<1x1x32x32xf32>
    tpu.vector_store %arg9[%c0_127, %c2_128, %c0_129, %c0_130], %133 {strides = array<i32>} : memref<1x8x32x32xf32, #tpu.memory_space<vmem>>, vector<1x1x32x32xf32>,
    %134 = vector.extract_strided_slice %121 {offsets = [0, 96], sizes = [32, 32], strides = [1, 1]} : vector<32x256xf32> to vector<32x32xf32>
    %c0_131 = arith.constant 0 : index
    %c3_132 = arith.constant 3 : index
    %c0_133 = arith.constant 0 : index
    %c0_134 = arith.constant 0 : index
    %135 = vector.load %arg9[%c0_131, %c3_132, %c0_133, %c0_134] : memref<1x8x32x32xf32, #tpu.memory_space<vmem>>, vector<1x1x32x32xf32>
    %136 = vector.shape_cast %135 : vector<1x1x32x32xf32> to vector<32x32xf32>
    %137 = vector.shape_cast %134 : vector<32x32xf32> to vector<1x1x32x32xf32>
    tpu.vector_store %arg9[%c0_131, %c3_132, %c0_133, %c0_134], %137 {strides = array<i32>} : memref<1x8x32x32xf32, #tpu.memory_space<vmem>>, vector<1x1x32x32xf32>,
    %138 = vector.extract_strided_slice %121 {offsets = [0, 128], sizes = [32, 32], strides = [1, 1]} : vector<32x256xf32> to vector<32x32xf32>
    %c0_135 = arith.constant 0 : index
    %c4 = arith.constant 4 : index
    %c0_136 = arith.constant 0 : index
    %c0_137 = arith.constant 0 : index
    %139 = vector.load %arg9[%c0_135, %c4, %c0_136, %c0_137] : memref<1x8x32x32xf32, #tpu.memory_space<vmem>>, vector<1x1x32x32xf32>
    %140 = vector.shape_cast %139 : vector<1x1x32x32xf32> to vector<32x32xf32>
    %141 = vector.shape_cast %138 : vector<32x32xf32> to vector<1x1x32x32xf32>
    tpu.vector_store %arg9[%c0_135, %c4, %c0_136, %c0_137], %141 {strides = array<i32>} : memref<1x8x32x32xf32, #tpu.memory_space<vmem>>, vector<1x1x32x32xf32>,
    %142 = vector.extract_strided_slice %121 {offsets = [0, 160], sizes = [32, 32], strides = [1, 1]} : vector<32x256xf32> to vector<32x32xf32>
    %c0_138 = arith.constant 0 : index
    %c5 = arith.constant 5 : index
    %c0_139 = arith.constant 0 : index
    %c0_140 = arith.constant 0 : index
    %143 = vector.load %arg9[%c0_138, %c5, %c0_139, %c0_140] : memref<1x8x32x32xf32, #tpu.memory_space<vmem>>, vector<1x1x32x32xf32>
    %144 = vector.shape_cast %143 : vector<1x1x32x32xf32> to vector<32x32xf32>
    %145 = vector.shape_cast %142 : vector<32x32xf32> to vector<1x1x32x32xf32>
    tpu.vector_store %arg9[%c0_138, %c5, %c0_139, %c0_140], %145 {strides = array<i32>} : memref<1x8x32x32xf32, #tpu.memory_space<vmem>>, vector<1x1x32x32xf32>,
    %146 = vector.extract_strided_slice %121 {offsets = [0, 192], sizes = [32, 32], strides = [1, 1]} : vector<32x256xf32> to vector<32x32xf32>
    %c0_141 = arith.constant 0 : index
    %c6 = arith.constant 6 : index
    %c0_142 = arith.constant 0 : index
    %c0_143 = arith.constant 0 : index
    %147 = vector.load %arg9[%c0_141, %c6, %c0_142, %c0_143] : memref<1x8x32x32xf32, #tpu.memory_space<vmem>>, vector<1x1x32x32xf32>
    %148 = vector.shape_cast %147 : vector<1x1x32x32xf32> to vector<32x32xf32>
    %149 = vector.shape_cast %146 : vector<32x32xf32> to vector<1x1x32x32xf32>
    tpu.vector_store %arg9[%c0_141, %c6, %c0_142, %c0_143], %149 {strides = array<i32>} : memref<1x8x32x32xf32, #tpu.memory_space<vmem>>, vector<1x1x32x32xf32>,
    %150 = vector.extract_strided_slice %121 {offsets = [0, 224], sizes = [32, 32], strides = [1, 1]} : vector<32x256xf32> to vector<32x32xf32>
    %c0_144 = arith.constant 0 : index
    %c7 = arith.constant 7 : index
    %c0_145 = arith.constant 0 : index
    %c0_146 = arith.constant 0 : index
    %151 = vector.load %arg9[%c0_144, %c7, %c0_145, %c0_146] : memref<1x8x32x32xf32, #tpu.memory_space<vmem>>, vector<1x1x32x32xf32>
    %152 = vector.shape_cast %151 : vector<1x1x32x32xf32> to vector<32x32xf32>
    %153 = vector.shape_cast %150 : vector<32x32xf32> to vector<1x1x32x32xf32>
    tpu.vector_store %arg9[%c0_144, %c7, %c0_145, %c0_146], %153 {strides = array<i32>} : memref<1x8x32x32xf32, #tpu.memory_space<vmem>>, vector<1x1x32x32xf32>,
    return
  }
  func.func @transform_0(%arg0: i32) -> (i32, i32, i32, i32) {
    %c0_i32 = arith.constant 0 : i32
    %c0_i32_0 = arith.constant 0 : i32
    %c0_i32_1 = arith.constant 0 : i32
    %c0_i32_2 = arith.constant 0 : i32
    return %arg0, %c0_i32, %c0_i32_0, %c0_i32_1 : i32, i32, i32, i32
  }
  func.func @transform_1(%arg0: i32) -> (i32, i32, i32) {
    %c0_i32 = arith.constant 0 : i32
    %c0_i32_0 = arith.constant 0 : i32
    %c0_i32_1 = arith.constant 0 : i32
    %c0_i32_2 = arith.constant 0 : i32
    return %c0_i32, %c0_i32_0, %c0_i32_1 : i32, i32, i32
  }
  func.func @transform_2(%arg0: i32) -> (i32, i32, i32) {
    %c0_i32 = arith.constant 0 : i32
    %c0_i32_0 = arith.constant 0 : i32
    %c0_i32_1 = arith.constant 0 : i32
    %c0_i32_2 = arith.constant 0 : i32
    return %c0_i32, %c0_i32_0, %c0_i32_1 : i32, i32, i32
  }
  func.func @transform_3(%arg0: i32) -> (i32, i32, i32) {
    %c0_i32 = arith.constant 0 : i32
    %c0_i32_0 = arith.constant 0 : i32
    %c0_i32_1 = arith.constant 0 : i32
    %c0_i32_2 = arith.constant 0 : i32
    return %c0_i32, %c0_i32_0, %c0_i32_1 : i32, i32, i32
  }
  func.func @transform_4(%arg0: i32) -> (i32, i32, i32) {
    %c0_i32 = arith.constant 0 : i32
    %c0_i32_0 = arith.constant 0 : i32
    %c0_i32_1 = arith.constant 0 : i32
    %c0_i32_2 = arith.constant 0 : i32
    return %c0_i32, %c0_i32_0, %c0_i32_1 : i32, i32, i32
  }
  func.func @transform_5(%arg0: i32) -> (i32, i32) {
    %c0_i32 = arith.constant 0 : i32
    %c0_i32_0 = arith.constant 0 : i32
    %c0_i32_1 = arith.constant 0 : i32
    return %c0_i32, %c0_i32_0 : i32, i32
  }
  func.func @transform_6(%arg0: i32) -> (i32, i32) {
    %c0_i32 = arith.constant 0 : i32
    %c0_i32_0 = arith.constant 0 : i32
    %c0_i32_1 = arith.constant 0 : i32
    return %c0_i32, %c0_i32_0 : i32, i32
  }
  func.func @transform_7(%arg0: i32) -> i32 {
    %c0_i32 = arith.constant 0 : i32
    %c0_i32_0 = arith.constant 0 : i32
    return %c0_i32 : i32
  }
  func.func @transform_8(%arg0: i32) -> (i32, i32, i32, i32) {
    %c0_i32 = arith.constant 0 : i32
    %c0_i32_0 = arith.constant 0 : i32
    %c0_i32_1 = arith.constant 0 : i32
    %c0_i32_2 = arith.constant 0 : i32
    return %arg0, %c0_i32, %c0_i32_0, %c0_i32_1 : i32, i32, i32, i32
  }
}

</mosaic_0001>

<bundles_post_ra>
// kernel: _lambda_.1
= control target key start
LH: loop header
LB: loop body
LE: loop exit
PB: predicated region body
PF: predicated region fallthrough
CT: control target
= control target key end

     0   :  { %13 = vsyncpa [#allocation6], 0  ;;  %s4249_s0 = inlined_call_operand.vmem [shape: f32[2,4,16,16], index: 0, kind: input, shape index: {}]   ;;  %s4250_s1 = inlined_call_operand.vmem [shape: bf16[3,64,256], index: 1, kind: input, shape index: {}]   ;;  %s4251_s2 = inlined_call_operand.vmem [shape: bf16[3,128,128], index: 2, kind: input, shape index: {}]   ;;  %s4252_s3 = inlined_call_operand.vmem [shape: bf16[3,128,256], index: 3, kind: input, shape index: {}]   ;;  %s4253_s4 = inlined_call_operand.vmem [shape: bf16[3,128,128], index: 4, kind: input, shape index: {}]   ;;  %s4254_s5 = inlined_call_operand.vmem [shape: bf16[32,16], index: 5, kind: input, shape index: {}]   ;;  %s4255_s6 = inlined_call_operand.vmem [shape: bf16[128,256], index: 6, kind: input, shape index: {}]   ;;  %s4256_s7 = inlined_call_operand.vmem [shape: f32[4], index: 7, kind: input, shape index: {}]   ;;  %s4257_s8 = inlined_call_operand.hbm [shape: f32[2,8,32,32], index: 8, kind: output, shape index: {}]  }
   0x1   :  { %14 = vsyncpa [#allocation5], 0 }
   0x2   :  { %16 = vsyncpa [#allocation5 + $0x1], 0  ;;  %s3483_s27 = smov 0   ;;  %s3485_s28 = smov 0  }
   0x3   :  { %s3487_s29 = smov 0   ;;  %s3489_s30 = smov 0  }
   0x4 LB: > { %s3504_s9 = sadd.s32 4294967295, %s3424_s30   ;;  %s2520_s10 = sadd.s32 4294967294, %s3424_s30   ;;  %s3424_s30 = sphi %s3489_s30, %s4266_s30   ;;  %s3420_s29 = sphi %s3487_s29, %s4265_s29   ;;  %s3416_s28 = sphi %s3485_s28, %s4264_s28   ;;  %s3412_s27 = sphi %s3483_s27, %s4263_s27  }
   0x5   : > { %s3508_s11 = sadd.s32 1, %s3424_s30   ;;  %s202_s12 = sadd.s32 1, %s3420_s29 }
   0x6   : > { %s199_s13 = ssub.s32 %s3424_s30, %s3508_s11  ;;  %p212_p0 = scmp.ne.s32.totalorder %s3420_s29, %s3416_s28 }
   0x7   : > { %p200_p1 = scmp.eq.s32.totalorder %s199_s13, 0  ;;  %p213_p2 = scmp.eq.s32.totalorder %s3504_s9, 1 }
   0x8   : > { %p218_p3 = scmp.ne.s32.totalorder %s3416_s28, %s3412_s27  ;;  %p219_p4 = scmp.eq.s32.totalorder %s2520_s10, 1 }
   0x9   : > { %s3519_s14 = scalar_select %p200_p1, %s3420_s29, %s202_s12  }
   0xa   : > { %p3521_p5 = por %p213_p2, %p212_p0  ;;  %p3525_p6 = por %p219_p4, %p218_p3 }
   0xb   : > { %p2521_p7 = scmp.ge.s32.totalorder %s3424_s30, 1  ;;  %p226_p8 = scmp.lt.s32.totalorder %s3424_s30, 3 }
   0xc   : > { %p3101_p9 = scmp.eq.s32.totalorder %s3504_s9, 0  ;;  %s257_s20 = sshll.u32 %s4256_s7, 4  ;;  %s258_s20 = int_to_ptr.vmem [resolvable:$true] %s257_s20 }
   0xd   : > { %p3532_p10 = pnand %p2521_p7, %p226_p8  ;;  %s3343_s21 = scalar_lea.vmem %s258_s20, 16 }
   0xe   : > { %p3344_p13 = scmp.ne.s32.totalorder %s258_s20, %s3343_s21  ;;  %p3351_p3 = scmp.lt.s32.totalorder %s258_s20, %s258_s20 }
   0xf   : > { %p3093_p11 = pneg %p3532_p10  ;;  %p3352_p4 = scmp.lt.s32.totalorder %s3343_s21, %s3343_s21 }
  0x11   : > { %p3094_p12 = pnand %p3101_p9, %p3093_p11  ;;  %p3353_p7 = por %p3352_p4, %p3351_p3 }
  0x13   : > { %p3345_p0 = pneg %p3094_p12 }
  0x15   : > { %p3346_p1 = pnand %p3345_p0, %p3344_p13 }
  0x17   : > { %p3347_p2 = pneg %p3346_p1 }
  0x19   : > { %p3354_p8 = pnand %p3353_p7, %p3347_p2 }
  0x1b   : > { %3357 = shalt.err (!%p3354_p8)
}
  0x1c   : > { %s3426_s22 = smov [#allocation4]   ;;  %278 = sbr.rel (%p3532_p10) target bundleno = 1952 (0x7a0), region = 52 }
  0x1d   : > { %3096 = dma.vmem_to_smem (!%p3094_p12), %s258_s20, 16, %s3426_s22, [#allocation6]  }
  0x23   : > { %3403 = dma.done.wait (%p3101_p9), [#allocation6], 16  }
  0x24   : > { %3405 = vsyncadd (%p3101_p9), [#allocation6], 4294967280 }
  0x25   : > { %284 = sfence }
  0x26   : > { %p313_p11 = scmp.lt.s32.totalorder %s3504_s9, 1  ;;  %vm319_vm0 = vcmask 516096   ;;  %v3427_v0 = vmov 0   ;;  %vm337_vm1 = vcmask 1040384   ;;  %vm338_vm2 = vcmask 1044484   ;;  %s3428_s17 = smov 16  }
  0x27   : > { %550 = vmatprep.mubr.bf16.mxu0 %v3427_v0  ;;  %323 = vst [vmem:[#allocation3] sm:$0x1] %v3427_v0  ;;  %320 = vst.msk [vmem:[#allocation2] sm:$0x1] %vm319_vm0, %v3427_v0  ;;  %v3147_v17 = vld [vmem:[%s4250_s1 + $0x44] ss:$8 sps:$4 sm:$0xff]  }
  0x28   : > { %s314_s23 = scalar_select %p313_p11, %s3504_s9, 1  ;;  %vm348_vm3 = vcmask 125953   ;;  %v2546_v24 = vld [vmem:[%s4250_s1 + $0x40] sm:$0xff]  ;;  %v2547_v25 = vld [vmem:[%s4250_s1 + $0x48] sm:$0xff]  ;;  %vm3570_vm4 = vmor %vm337_vm1, %vm338_vm2  ;;  %518 = vmatprep.subr.bf16.mxu0 %v3147_v17  ;;  %vm352_vm5 = vcmask 122880   ;;  %vm350_vm6 = vcmask 125952  }
  0x29   : > { %s3429_s18 = smov 32   ;;  %v3149_v30 = vld [vmem:[%s4250_s1 + $0x54] ss:$8 sps:$4 sm:$0xff]   ;;  %v2556_v33 = vcombine.low %v2546_v24, %v2547_v25  ;;  %s3430_s25 = smov 48   ;;  %v3151_v40 = vld [vmem:[%s4250_s1 + $0x50] ss:$8 sps:$4 sm:$0xff]  }
  0x2a   : > { %s2856_s24 = sshll.u32 %s314_s23, 6  ;;  %v3152_v41 = vld [vmem:[%s4250_s1 + $0x64] ss:$8 sps:$4 sm:$0xff]   ;;  %v3154_v42 = vld [vmem:[%s4250_s1 + $0x60] ss:$8 sps:$4 sm:$0xff]   ;;  %v3431_v51 = vmov 0.0  }
  0x2b   : > { %s317_s10 = scalar_lea.vmem %s4249_s0, %s2856_s24  ;;  %519 = vmatpush1.bf16.msra.mxu0 %v2556_v33  ;;  %v3155_v43 = vld [vmem:[%s4250_s1 + $0x74] ss:$8 sps:$4 sm:$0xff]   ;;  %v3157_v46 = vld [vmem:[%s4250_s1 + $0x70] ss:$8 sps:$4 sm:$0xff]   ;;  %v3160_v48 = vld [vmem:[%s4250_s1 + $0x4] ss:$8 sps:$4 sm:$0xff]   ;;  %2929 = vmatprep.subr.bf16.mxu1 %v3431_v51 }
  0x2c   : > { %v2534_v1 = vld [vmem:[%s317_s10 + $0x10] sm:$0xff]  ;;  %v2538_v2 = vld [vmem:[%s317_s10 + $0x20] sm:$0xff]  ;;  %v2535_v7 = vld [vmem:[%s317_s10 + $0x18] sm:$0xff]  ;;  %520 = vmatprep.subr.bf16.mxu0 %v3149_v30  ;;  %vm377_vm7 = vcmask 257153   ;;  %vm406_vm8 = vcmask 388353   ;;  %vm435_vm9 = vcmask 519553  }
  0x2d   : > { %v2542_v3 = vld [vmem:[%s317_s10 + $0x30] sm:$0xff]  ;;  %v2859_v4 = vpack.c.bf16 %v2534_v1, %v2534_v1  ;;  %v2861_v5 = vpack.c.bf16 %v2538_v2, %v2538_v2  ;;  %v2539_v8 = vld [vmem:[%s317_s10 + $0x28] sm:$0xff]  ;;  %v2860_v9 = vpack.c.bf16 %v2535_v7, %v2535_v7  ;;  %v2543_v11 = vld [vmem:[%s317_s10 + $0x38] sm:$0xff]  ;;  %vm381_vm10 = vcmask 254080   ;;  %s325_s21 = sld [smem:[#allocation4]]  ;;  %s2529_s24 = sld [smem:[#allocation4 + $0x1]] }
  0x2e   : > { %v2863_v6 = vpack.c.bf16 %v2542_v3, %v2542_v3  ;;  %v2862_v10 = vpack.c.bf16 %v2539_v8, %v2539_v8  ;;  %v329_v12 = vld [vmem:[%s317_s10] sm:$0xff]  ;;  %v330_v13 = vld [vmem:[%s317_s10 + $0x8] sm:$0xff]  ;;  %v2864_v22 = vpack.c.bf16 %v2543_v11, %v2543_v11  ;;  %vm379_vm11 = vcmask 257152   ;;  %v3175_v25 = vld [vmem:[%s4250_s1 + $0x90] ss:$8 sps:$4 sm:$0xff]   ;;  %s2530_s10 = sld [smem:[#allocation4 + $0x2]] }
  0x2f   : > { %v363_v14 = vrot.slane %v2859_v4, 7  ;;  %v392_v15 = vrot.slane %v2861_v5, 7  ;;  %v2857_v16 = vpack.c.bf16 %v329_v12, %v329_v12  ;;  %v365_v18 = vrot.slane %v2860_v9, 7  ;;  %521 = vmatpush1.bf16.msra.mxu0 %v3151_v40  ;;  %v3185_v49 = vld [vmem:[%s4251_s2 + $0x40] sm:$0xff]   ;;  %v3186_v50 = vld [vmem:[%s4251_s2 + $0x48] sm:$0xff]   ;;  %s2531_s26 = sld [smem:[#allocation4 + $0x3]] }
  0x30   : > { %v2858_v19 = vpack.c.bf16 %v330_v13, %v330_v13  ;;  %v421_v20 = vrot.slane %v2863_v6, 7  ;;  %v394_v21 = vrot.slane %v2862_v10, 7  ;;  %v423_v35 = vrot.slane %v2864_v22, 7  ;;  %522 = vmatprep.subr.bf16.mxu0 %v3152_v41  ;;  %2930 = vmatpush3.bf16.msra.mxu1 %v3185_v49  ;;  %v3158_v2 = vld [vmem:[%s4250_s1] ss:$8 sps:$4 sm:$0xff]   ;;  %s3433_s12 = smov 96  }
  0x31   : > { %368 = vrot.lane.b32.xlu0 %v363_v14, %s3428_s17  ;;  %397 = vrot.lane.b32.xlu1 %v392_v15, %s3429_s18  ;;  %v340_v23 = vrot.slane %v2857_v16, 7  ;;  %v364_v26 = vrot.slane %v363_v14, 4  ;;  %v367_v27 = vrot.slane %v365_v18, 4  ;;  %v393_v37 = vrot.slane %v392_v15, 4  ;;  %v3165_v5 = vld [vmem:[%s4250_s1 + $0x14] ss:$8 sps:$4 sm:$0xff]  }
  0x32   : > { %v342_v29 = vrot.slane %v2858_v19, 7  ;;  %v396_v34 = vrot.slane %v394_v21, 4  ;;  %v422_v38 = vrot.slane %v421_v20, 4  ;;  %v425_v47 = vrot.slane %v423_v35, 4  ;;  %2931 = vmatprep.subr.bf16.mxu1 %v3431_v51  ;;  %v3163_v9 = vld [vmem:[%s4250_s1 + $0x10] ss:$8 sps:$4 sm:$0xff]  }
  0x33   : > { %v341_v31 = vrot.slane %v340_v23, 4  ;;  %349 = vst.msk [vmem:[#allocation2] sm:$0xe] %vm348_vm3, %v340_v23  ;;  %v366_v39 = vsel %vm3570_vm4, %v364_v26, %v365_v18  ;;  %v395_v44 = vsel %vm3570_vm4, %v393_v37, %v394_v21  ;;  %523 = vmatpush1.bf16.msra.mxu0 %v3154_v42  ;;  %vm410_vm12 = vcmask 385280   ;;  %v3168_v10 = vld [vmem:[%s4250_s1 + $0x24] ss:$8 sps:$4 sm:$0xff]  }
  0x34   : > { %v344_v32 = vrot.slane %v342_v29, 4  ;;  %v424_v45 = vsel %vm3570_vm4, %v422_v38, %v423_v35  ;;  %524 = vmatprep.subr.bf16.mxu0 %v3155_v43  ;;  %2932 = vmatpush3.bf16.msra.mxu1 %v3186_v50  ;;  %vm408_vm13 = vcmask 388352   ;;  %vm437_vm14 = vcmask 519552   ;;  %v3166_v12 = vld [vmem:[%s4250_s1 + $0x20] ss:$8 sps:$4 sm:$0xff]   ;;  %v3187_v42 = vld [vmem:[%s4251_s2 + $0x50] sm:$0xff]  }
  0x35   : > { %426 = vrot.lane.b32.xlu0 %v421_v20, %s3430_s25  ;;  %372 = vrot.lane.b32.xlu1 %v367_v27, %s3428_s17  ;;  %v343_v36 = vsel %vm3570_vm4, %v341_v31, %v342_v29  ;;  %vm439_vm15 = vcmask 516480   ;;  %vm470_vm0 = vcmask 1046528   ;;  %vm514_vm1 = vcmask 523264   ;;  %v3171_v13 = vld [vmem:[%s4250_s1 + $0x34] ss:$8 sps:$4 sm:$0xff]   ;;  %v3300_v28 = vld [vmem:[%s4253_s4 + $0x8] sm:$0xff]  }
  0x36   : > { %353 = vst.msk [vmem:[#allocation2 + $0x8] sm:$0x1] %vm352_vm5, %v344_v32  ;;  %2933 = vmatprep.subr.bf16.mxu1 %v3431_v51  ;;  %v3169_v16 = vld [vmem:[%s4250_s1 + $0x30] ss:$8 sps:$4 sm:$0xff]   ;;  %v3174_v18 = vld [vmem:[%s4250_s1 + $0x84] ss:$8 sps:$4 sm:$0xff]  }
  0x37   : > { %351 = vst.msk [vmem:[#allocation2 + $0x4] sm:$0xf] %vm350_vm6, %v343_v36  ;;  %525 = vmatpush1.bf16.msra.mxu0 %v3157_v46  ;;  %vm564_vm2 = vsmask.f32 7424  ;;  %v3172_v21 = vld [vmem:[%s4250_s1 + $0x80] ss:$8 sps:$4 sm:$0xff]  }
  0x38   : > { %620 = vmatprep.subr.bf16.mxu0 %v3160_v48  ;;  %v3177_v22 = vld [vmem:[%s4250_s1 + $0x94] ss:$8 sps:$4 sm:$0xff]   ;;  %v3180_v26 = vld [vmem:[%s4250_s1 + $0xa4] ss:$8 sps:$4 sm:$0xff]   ;;  %v3178_v30 = vld [vmem:[%s4250_s1 + $0xa0] ss:$8 sps:$4 sm:$0xff]   ;;  %2934 = vmatpush3.bf16.msra.mxu1 %v3187_v42 }
  0x39   : > { %370 = vrot.lane.b32.xlu0 %v366_v39, %s3428_s17  ;;  %401 = vrot.lane.b32.xlu1 %v396_v34, %s3429_s18  ;;  %v3183_v33 = vld [vmem:[%s4250_s1 + $0xb4] ss:$8 sps:$4 sm:$0xff]   ;;  %v3181_v36 = vld [vmem:[%s4250_s1 + $0xb0] ss:$8 sps:$4 sm:$0xff]   ;;  %vm676_vm3 = vsmask.f32 6400 }
  0x3a   : > { %2935 = vmatprep.subr.bf16.mxu1 %v3431_v51  ;;  %v3188_v43 = vld [vmem:[%s4251_s2 + $0x58] sm:$0xff]   ;;  %v3191_v46 = vld [vmem:[%s4251_s2 + $0x70] sm:$0xff]   ;;  %vm3432_vm5 = vmmov 0   ;;  %v3213_v48 = vld [vmem:[%s4252_s3 + $0x80] ss:$8 sps:$4 sm:$0xff]   ;;  %s310_s17 = sand.u32 1, %s3416_s28  }
  0x3b   : > { %2945 = vmatprep.mubr.msk.bf16.mxu1 %vm3432_vm5, %v3431_v51  ;;  %v3215_v49 = vld [vmem:[%s4252_s3 + $0x84] ss:$8 sps:$4 sm:$0xff]   ;;  %v3218_v50 = vld [vmem:[%s4252_s3 + $0x94] ss:$8 sps:$4 sm:$0xff]   ;;  %s3434_s13 = smov 64   ;;  %s3435_s23 = smov [#allocation7]  }
  0x3c   : > { %2936 = vmatpush3.bf16.msra.mxu1 %v3188_v43  ;;  %v3210_v42 = vld [vmem:[%s4251_s2 + $0xb0] sm:$0xff]  }
  0x3d   : > { %399 = vrot.lane.b32.xlu0 %v395_v44, %s3429_s18  ;;  %428 = vrot.lane.b32.xlu1 %v424_v45, %s3430_s25  ;;  %v3189_v44 = vld [vmem:[%s4251_s2 + $0x60] sm:$0xff]   ;;  %v3190_v45 = vld [vmem:[%s4251_s2 + $0x68] sm:$0xff]  }
  0x3e   : > { %2937 = vmatprep.subr.bf16.mxu1 %v3431_v51 }
  0x40   : > { %2938 = vmatpush3.bf16.msra.mxu1 %v3189_v44 }
  0x41   : > { %430 = vrot.lane.b32.xlu0 %v425_v47, %s3430_s25  ;;  %2939 = vmatprep.subr.bf16.mxu1 %v3431_v51  ;;  %v3192_v47 = vld [vmem:[%s4251_s2 + $0x78] sm:$0xff]  }
  0x44   : > { %2940 = vmatpush3.bf16.msra.mxu1 %v3190_v45 }
  0x45   : > { %2941 = vmatprep.subr.bf16.mxu1 %v3431_v51 }
  0x48   : > { %2942 = vmatpush3.bf16.msra.mxu1 %v3191_v46 }
  0x49   : > { %2943 = vmatprep.subr.bf16.mxu1 %v3431_v51 }
  0x4c   : > { %2944 = vmatpush3.bf16.msra.mxu1 %v3192_v47  ;;  %v3211_v47 = vld [vmem:[%s4251_s2 + $0xb8] sm:$0xff]  }
  0x4d   : > { %2949 = vmatprep.subr.bf16.mxu1 %v3431_v51 }
  0xa3   : > { %v369_v52 = vpop.permute.xlu0 %368  ;;  %v398_v53 = vpop.permute.xlu1 %397 }
  0xa4   : > { %378 = vst.msk [vmem:[#allocation2] sm:$0xe] %vm377_vm7, %v369_v52  ;;  %v3216_v52 = vld [vmem:[%s4252_s3 + $0x90] ss:$8 sps:$4 sm:$0xff]  }
  0xa5   : > { %407 = vst.msk [vmem:[#allocation2] sm:$0xe] %vm406_vm8, %v398_v53  ;;  %v786_v53 = vstv %s325_s21 }
  0xa7   : > { %v427_v54 = vpop.permute.xlu0 %426  ;;  %v373_v55 = vpop.permute.xlu1 %372 }
  0xa8   : > { %436 = vst.msk [vmem:[#allocation2] sm:$0xe] %vm435_vm9, %v427_v54 }
  0xa9   : > { %382 = vst.msk [vmem:[#allocation2 + $0x8] sm:$0x1] %vm381_vm10, %v373_v55 }
  0xab   : > { %v371_v56 = vpop.permute.xlu0 %370  ;;  %v402_v57 = vpop.permute.xlu1 %401 }
  0xac   : > { %380 = vst.msk [vmem:[#allocation2 + $0x4] sm:$0xf] %vm379_vm11, %v371_v56 }
  0xad   : > { %411 = vst.msk [vmem:[#allocation2 + $0x8] sm:$0x1] %vm410_vm12, %v402_v57 }
  0xaf   : > { %v400_v58 = vpop.permute.xlu0 %399  ;;  %v429_v59 = vpop.permute.xlu1 %428  ;;  %v452_v62 = vld [vmem:[#allocation2] sm:$0xe] }
  0xb0   : > { %409 = vst.msk [vmem:[#allocation2 + $0x4] sm:$0xf] %vm408_vm13, %v400_v58  ;;  %v441_v6 = vld [vmem:[#allocation2] sm:$0xf] }
  0xb1   : > { %438 = vst.msk [vmem:[#allocation2 + $0x4] sm:$0xf] %vm437_vm14, %v429_v59  ;;  %vm2312_vm14 = vcmask 261120  }
  0xb3   : > { %v431_v60 = vpop.permute.xlu0 %430 }
  0xb4   : > { %440 = vst.msk [vmem:[#allocation2 + $0x8] sm:$0x1] %vm439_vm15, %v431_v60 }
  0xb8   : > { %v442_v61 = vld [vmem:[#allocation2 + $0x4] sm:$0xf] }
  0xb9   : > { %v2554_v63 = vcombine.low %v452_v62, %v442_v61  ;;  %v2565_v8 = vcombine.low %v441_v6, %v442_v61 }
  0xbb   : > { %v3162_v1 = vld [vmem:[#allocation2 + $0x8] ss:$0 sps:$4 sm:$0x11]   ;;  %v471_v3 = vrot.slane %v2554_v63, 1  ;;  %v568_v11 = vshll.u32 %v2565_v8, 16  ;;  %v566_v17 = vshrl.u32 %v2565_v8, 16 }
  0xbc   : > { %v472_v4 = vrot.slane %v3162_v1, 1  ;;  %v573_v15 = vshll.u32 %v3162_v1, 16  ;;  %v3184_v24 = vld [vmem:[#allocation2 + $0x8] ss:$0 sps:$4 sm:$0x33]   ;;  %v678_v31 = vshrl.u32 %v2554_v63, 16 }
  0xbd   : > { %v570_v14 = vrot.slane %v568_v11, 1  ;;  %v686_v27 = vshrl.u32 %v3184_v24, 16  ;;  %v689_v29 = vshll.u32 %v3184_v24, 16  ;;  %v681_v32 = vshll.u32 %v2554_v63, 16  ;;  %v3202_v24 = vld [vmem:[%s4251_s2 + $0x38] sm:$0xff]  }
  0xbe   : > { %v473_v7 = vsel %vm470_vm0, %v471_v3, %v472_v4  ;;  %v575_v20 = vrot.slane %v573_v15, 1  ;;  %v680_v37 = vrot.slane %v678_v31, 1  ;;  %v3197_v15 = vld [vmem:[%s4251_s2 + $0x10] sm:$0xff]  }
  0xbf   : > { %2564 = vmatmul.mubr.msk.bf16.vlgmr.msra.gmra.mrb[0].mxu0 %vm514_vm1, %v473_v7  ;;  %v571_v19 = vor.u32 %v570_v14, %v566_v17  ;;  %v688_v34 = vrot.slane %v686_v27, 1  ;;  %v691_v35 = vrot.slane %v689_v29, 2  ;;  %v683_v38 = vrot.slane %v681_v32, 2  ;;  %v3196_v14 = vld [vmem:[%s4251_s2 + $0x8] sm:$0xff]   ;;  %v3199_v17 = vld [vmem:[%s4251_s2 + $0x20] sm:$0xff]  }
  0xc0   : > { %621 = vmatpush1.bf16.msra.mxu0 %v3158_v2  ;;  %652 = vmatprep.mubr.bf16.mxu0 %v3427_v0  ;;  %v3205_v32 = vld [vmem:[%s4251_s2 + $0x88] sm:$0xff]  }
  0xc1   : > { %622 = vmatprep.subr.bf16.mxu0 %v3165_v5  ;;  %v576_v23 = vsel %vm564_vm2, %v571_v19, %v575_v20  ;;  %v692_v39 = vor.u32 %v691_v35, %v688_v34  ;;  %v684_v40 = vor.u32 %v683_v38, %v680_v37  ;;  %v3200_v20 = vld [vmem:[%s4251_s2 + $0x28] sm:$0xff]   ;;  %v3207_v34 = vld [vmem:[%s4251_s2 + $0x98] sm:$0xff]   ;;  %v3208_v35 = vld [vmem:[%s4251_s2 + $0xa0] sm:$0xff]  }
  0xc2   : > { %v3209_v37 = vld [vmem:[%s4251_s2 + $0xa8] sm:$0xff]  }
  0xc3   : > { %v693_v41 = vsel %vm676_vm3, %v684_v40, %v692_v39 }
  0xc4   : > { %623 = vmatpush1.bf16.msra.mxu0 %v3163_v9 }
  0xc5   : > { %624 = vmatprep.subr.bf16.mxu0 %v3168_v10 }
  0xc8   : > { %625 = vmatpush1.bf16.msra.mxu0 %v3166_v12  ;;  %v3195_v12 = vld [vmem:[%s4251_s2] sm:$0xff]  }
  0xc9   : > { %626 = vmatprep.subr.bf16.mxu0 %v3171_v13 }
  0xcc   : > { %627 = vmatpush1.bf16.msra.mxu0 %v3169_v16  ;;  %v3198_v16 = vld [vmem:[%s4251_s2 + $0x18] sm:$0xff]  }
  0xcd   : > { %737 = vmatprep.subr.bf16.mxu0 %v3174_v18 }
  0xcf   : > { %2574 = vmatmul.mubr.msk.bf16.vlgmr.msra.gmra.mrb[0].mxu0 %vm514_vm1, %v576_v23 }
  0xd0   : > { %738 = vmatpush1.bf16.msra.mxu0 %v3172_v21  ;;  %769 = vmatprep.mubr.bf16.mxu0 %v3427_v0 }
  0xd1   : > { %739 = vmatprep.subr.bf16.mxu0 %v3177_v22  ;;  %v3201_v22 = vld [vmem:[%s4251_s2 + $0x30] sm:$0xff]  }
  0xd4   : > { %740 = vmatpush1.bf16.msra.mxu0 %v3175_v25 }
  0xd5   : > { %741 = vmatprep.subr.bf16.mxu0 %v3180_v26 }
  0xd8   : > { %742 = vmatpush1.bf16.msra.mxu0 %v3178_v30  ;;  %v3204_v30 = vld [vmem:[%s4251_s2 + $0x80] sm:$0xff]  }
  0xd9   : > { %743 = vmatprep.subr.bf16.mxu0 %v3183_v33  ;;  %v3206_v33 = vld [vmem:[%s4251_s2 + $0x90] sm:$0xff]  }
  0xdc   : > { %744 = vmatpush1.bf16.msra.mxu0 %v3181_v36 }
  0xdd   : > { %1336 = vmatprep.subr.bf16.mxu0 %v3215_v49 }
  0xdf   : > { %2592 = vmatmul.mubr.msk.bf16.vlgmr.msra.gmra.mrb[0].mxu0 %vm514_vm1, %v693_v41 }
  0xe0   : > { %1368 = vmatprep.mubr.bf16.mxu0 %v3427_v0  ;;  %1337 = vmatpush1.bf16.msra.mxu0 %v3213_v48 }
  0xe1   : > { %1338 = vmatprep.subr.bf16.mxu0 %v3218_v50 }
  0xe4   : > { %1339 = vmatpush1.bf16.msra.mxu0 %v3216_v52  ;;  %v3221_v52 = vld [vmem:[%s4252_s3 + $0xa4] ss:$8 sps:$4 sm:$0xff]  }
  0xe5   : > { %1340 = vmatprep.subr.bf16.mxu0 %v3221_v52  ;;  %v3266_v52 = vld [vmem:[%s4252_s3 + $0x104] ss:$8 sps:$4 sm:$0xff]  }
 0x1b2   : > { %v771_v54 = vpop.f32.mrb[0].mxu0 }
 0x1b3   : > { %vm784_vm6 = vcmp.gt.f32.partialorder %v771_v54, 0.0  ;;  %v787_v55 = vmul.f32 %v786_v53, %v771_v54  ;;  %v3709_v56 = vpop.f32.mrb[1].mxu0 }
 0x1b4   : > { %v775_v57 = vpop.f32.mrb[2].mxu0 }
 0x1b5   : > { %v789_v58 = vsel %vm784_vm6, %v771_v54, %v787_v55  ;;  %vm785_vm7 = vcmp.gt.f32.partialorder %v775_v57, 0.0  ;;  %v788_v59 = vmul.f32 %v786_v53, %v775_v57  ;;  %v3711_v60 = vpop.f32.mrb[3].mxu0  ;;  %v3219_v53 = vld [vmem:[%s4252_s3 + $0xa0] ss:$8 sps:$4 sm:$0xff]   ;;  %v3224_v54 = vld [vmem:[%s4252_s3 + $0xb4] ss:$8 sps:$4 sm:$0xff]  }
 0x1b6   : > { %v2865_v61 = vpack.c.bf16 %v789_v58, %v789_v58  ;;  %1341 = vmatpush1.bf16.msra.mxu0 %v3219_v53  ;;  %v3222_v55 = vld [vmem:[%s4252_s3 + $0xb0] ss:$8 sps:$4 sm:$0xff]   ;;  %v3225_v58 = vld [vmem:[%s4252_s3 + $0xc0] ss:$8 sps:$4 sm:$0xff]  }
 0x1b7   : > { %v790_v62 = vsel %vm785_vm7, %v775_v57, %v788_v59  ;;  %1342 = vmatprep.subr.bf16.mxu0 %v3224_v54  ;;  %v3227_v57 = vld [vmem:[%s4252_s3 + $0xc4] ss:$8 sps:$4 sm:$0xff]   ;;  %v3230_v59 = vld [vmem:[%s4252_s3 + $0xd4] ss:$8 sps:$4 sm:$0xff]  }
 0x1b8   : > { %v797_v63 = vrot.slane %v2865_v61, 7  ;;  %v2866_v1 = vpack.c.bf16 %v790_v62, %v790_v62  ;;  %v3228_v61 = vld [vmem:[%s4252_s3 + $0xd0] ss:$8 sps:$4 sm:$0xff]   ;;  %v3233_v62 = vld [vmem:[%s4252_s3 + $0xe4] ss:$8 sps:$4 sm:$0xff]  }
 0x1ba   : > { %v798_v2 = vrot.slane %v797_v63, 4  ;;  %805 = vst [vmem:[#allocation3] sm:$0xe] %v797_v63  ;;  %v799_v3 = vrot.slane %v2866_v1, 7  ;;  %1343 = vmatpush1.bf16.msra.mxu0 %v3222_v55  ;;  %v3231_v63 = vld [vmem:[%s4252_s3 + $0xe0] ss:$8 sps:$4 sm:$0xff]  }
 0x1bb   : > { %1344 = vmatprep.subr.bf16.mxu0 %v3227_v57  ;;  %v3236_v1 = vld [vmem:[%s4252_s3 + $0xf4] ss:$8 sps:$4 sm:$0xff]   ;;  %v3264_v55 = vld [vmem:[%s4252_s3 + $0x100] ss:$8 sps:$4 sm:$0xff]  }
 0x1bc   : > { %v800_v4 = vsel %vm3570_vm4, %v798_v2, %v799_v3  ;;  %v801_v5 = vrot.slane %v799_v3, 4  ;;  %v3234_v2 = vld [vmem:[%s4252_s3 + $0xf0] ss:$8 sps:$4 sm:$0xff]   ;;  %v3239_v3 = vld [vmem:[%s4252_s3 + $0x4] ss:$8 sps:$4 sm:$0xff]  }
 0x1bd   : > { %806 = vst [vmem:[#allocation3 + $0x4] sm:$0xf] %v800_v4  ;;  %v3289_v4 = vld [vmem:[%s4253_s4 + $0x40] sm:$0xff]   ;;  %v3269_v57 = vld [vmem:[%s4252_s3 + $0x114] ss:$8 sps:$4 sm:$0xff]  }
 0x1be   : > { %807 = vst [vmem:[#allocation3 + $0x8] sm:$0x1] %v801_v5  ;;  %1345 = vmatpush1.bf16.msra.mxu0 %v3225_v58  ;;  %v3290_v5 = vld [vmem:[%s4253_s4 + $0x48] sm:$0xff]  }
 0x1bf   : > { %1346 = vmatprep.subr.bf16.mxu0 %v3230_v59  ;;  %v3267_v59 = vld [vmem:[%s4252_s3 + $0x110] ss:$8 sps:$4 sm:$0xff]  }
 0x1c1   : > { %v827_v7 = vld [vmem:[#allocation3] sm:$0xe] }
 0x1c2   : > { %v808_v18 = vld [vmem:[#allocation3] sm:$0xf]  ;;  %1347 = vmatpush1.bf16.msra.mxu0 %v3228_v61 }
 0x1c3   : > { %1348 = vmatprep.subr.bf16.mxu0 %v3233_v62  ;;  %v3272_v61 = vld [vmem:[%s4252_s3 + $0x124] ss:$8 sps:$4 sm:$0xff]   ;;  %v3270_v62 = vld [vmem:[%s4252_s3 + $0x120] ss:$8 sps:$4 sm:$0xff]  }
 0x1c4   : > { %v809_v6 = vld [vmem:[#allocation3 + $0x4] sm:$0xf] }
 0x1c5   : > { %v3715_v8 = vcombine.low %v827_v7, %v809_v6  ;;  %v3194_v9 = vld [vmem:[#allocation3 + $0x8] ss:$0 sps:$4 sm:$0x11]   ;;  %v2621_v19 = vcombine.low %v808_v18, %v809_v6  ;;  %v1185_v7 = vstv %s2529_s24  ;;  %s3362_s24 = sshll.u32 %s3435_s23, 4  ;;  %s3363_s24 = int_to_ptr.vmem [resolvable:$false] %s3362_s24 }
 0x1c6   : > { %v854_v11 = vrot.slane %v3194_v9, 1  ;;  %v957_v26 = vshll.u32 %v3194_v9, 16  ;;  %v3212_v36 = vld [vmem:[#allocation3 + $0x8] ss:$0 sps:$4 sm:$0x33]   ;;  %1349 = vmatpush1.bf16.msra.mxu0 %v3231_v63 }
 0x1c7   : > { %v853_v10 = vrot.slane %v3715_v8, 1  ;;  %v952_v21 = vshll.u32 %v2621_v19, 16  ;;  %v950_v25 = vshrl.u32 %v2621_v19, 16  ;;  %v1073_v38 = vshrl.u32 %v3715_v8, 16  ;;  %1350 = vmatprep.subr.bf16.mxu0 %v3236_v1  ;;  %v3275_v63 = vld [vmem:[%s4252_s3 + $0x134] ss:$8 sps:$4 sm:$0xff]  }
 0x1c8   : > { %v959_v29 = vrot.slane %v957_v26, 1  ;;  %v1076_v39 = vshll.u32 %v3715_v8, 16  ;;  %v1081_v40 = vshrl.u32 %v3212_v36, 16  ;;  %v1084_v41 = vshll.u32 %v3212_v36, 16  ;;  %v3237_v26 = vld [vmem:[%s4252_s3] ss:$8 sps:$4 sm:$0xff]  }
 0x1c9   : > { %v855_v13 = vsel %vm470_vm0, %v853_v10, %v854_v11  ;;  %v954_v23 = vrot.slane %v952_v21, 1  ;;  %v1075_v43 = vrot.slane %v1073_v38, 1  ;;  %v3248_v36 = vld [vmem:[%s4252_s3 + $0x30] ss:$8 sps:$4 sm:$0xff]   ;;  %v3251_v38 = vld [vmem:[%s4252_s3 + $0x40] ss:$8 sps:$4 sm:$0xff]  }
 0x1ca   : > { %2946 = vmatmul.mubr.bf16.vlgmr.msra.gmra.mrb[0].mxu1 %v855_v13  ;;  %v1078_v44 = vrot.slane %v1076_v39, 2  ;;  %v1083_v45 = vrot.slane %v1081_v40, 1  ;;  %v1086_v46 = vrot.slane %v1084_v41, 2  ;;  %1351 = vmatpush1.bf16.msra.mxu0 %v3234_v2  ;;  %v3256_v39 = vld [vmem:[%s4252_s3 + $0x54] ss:$8 sps:$4 sm:$0xff]  }
 0x1cb   : > { %2950 = vmatpush3.bf16.msra.mxu1 %v3195_v12  ;;  %2965 = vmatprep.mubr.msk.bf16.mxu1 %vm3432_vm5, %v3431_v51  ;;  %v955_v27 = vor.u32 %v954_v23, %v950_v25  ;;  %v3273_v1 = vld [vmem:[%s4252_s3 + $0x130] ss:$8 sps:$4 sm:$0xff]   ;;  %v3278_v2 = vld [vmem:[%s4252_s3 + $0x144] ss:$8 sps:$4 sm:$0xff]  }
 0x1cc   : > { %2951 = vmatprep.subr.bf16.mxu1 %v3431_v51  ;;  %v1079_v48 = vor.u32 %v1078_v44, %v1075_v43  ;;  %v1087_v49 = vor.u32 %v1086_v46, %v1083_v45  ;;  %1475 = vmatprep.subr.bf16.mxu0 %v3239_v3  ;;  %v3259_v43 = vld [vmem:[%s4252_s3 + $0x64] ss:$8 sps:$4 sm:$0xff]   ;;  %v3257_v45 = vld [vmem:[%s4252_s3 + $0x60] ss:$8 sps:$4 sm:$0xff]   ;;  %v3262_v46 = vld [vmem:[%s4252_s3 + $0x74] ss:$8 sps:$4 sm:$0xff]  }
 0x1cd   : > { %v960_v31 = vsel %vm564_vm2, %v955_v27, %v959_v29  ;;  %v3276_v3 = vld [vmem:[%s4252_s3 + $0x140] ss:$8 sps:$4 sm:$0xff]  }
 0x1ce   : > { %v1088_v50 = vsel %vm676_vm3, %v1079_v48, %v1087_v49  ;;  %v3260_v48 = vld [vmem:[%s4252_s3 + $0x70] ss:$8 sps:$4 sm:$0xff]  }
 0x1cf   : > { %2952 = vmatpush3.bf16.msra.mxu1 %v3196_v14 }
 0x1d0   : > { %2953 = vmatprep.subr.bf16.mxu1 %v3431_v51 }
 0x1d3   : > { %2954 = vmatpush3.bf16.msra.mxu1 %v3197_v15 }
 0x1d4   : > { %2955 = vmatprep.subr.bf16.mxu1 %v3431_v51 }
 0x1d7   : > { %2956 = vmatpush3.bf16.msra.mxu1 %v3198_v16 }
 0x1d8   : > { %2957 = vmatprep.subr.bf16.mxu1 %v3431_v51 }
 0x1db   : > { %2958 = vmatpush3.bf16.msra.mxu1 %v3199_v17 }
 0x1dc   : > { %2959 = vmatprep.subr.bf16.mxu1 %v3431_v51 }
 0x1df   : > { %2960 = vmatpush3.bf16.msra.mxu1 %v3200_v20 }
 0x1e0   : > { %2961 = vmatprep.subr.bf16.mxu1 %v3431_v51 }
 0x1e3   : > { %2962 = vmatpush3.bf16.msra.mxu1 %v3201_v22 }
 0x1e4   : > { %2963 = vmatprep.subr.bf16.mxu1 %v3431_v51 }
 0x1e7   : > { %2964 = vmatpush3.bf16.msra.mxu1 %v3202_v24 }
 0x1e8   : > { %2969 = vmatprep.subr.bf16.mxu1 %v3431_v51 }
 0x1ea   : > { %2966 = vmatmul.mubr.bf16.vlgmr.msra.gmra.mrb[0].mxu1 %v960_v31 }
 0x1eb   : > { %2970 = vmatpush3.bf16.msra.mxu1 %v3204_v30  ;;  %2985 = vmatprep.mubr.msk.bf16.mxu1 %vm3432_vm5, %v3431_v51  ;;  %v3244_v30 = vld [vmem:[%s4252_s3 + $0x14] ss:$8 sps:$4 sm:$0xff]  }
 0x1ec   : > { %2971 = vmatprep.subr.bf16.mxu1 %v3431_v51 }
 0x1ef   : > { %2972 = vmatpush3.bf16.msra.mxu1 %v3205_v32  ;;  %v3242_v32 = vld [vmem:[%s4252_s3 + $0x10] ss:$8 sps:$4 sm:$0xff]  }
 0x1f0   : > { %2973 = vmatprep.subr.bf16.mxu1 %v3431_v51 }
 0x1f3   : > { %2974 = vmatpush3.bf16.msra.mxu1 %v3206_v33  ;;  %v3247_v33 = vld [vmem:[%s4252_s3 + $0x24] ss:$8 sps:$4 sm:$0xff]  }
 0x1f4   : > { %2975 = vmatprep.subr.bf16.mxu1 %v3431_v51 }
 0x1f7   : > { %2976 = vmatpush3.bf16.msra.mxu1 %v3207_v34  ;;  %v3245_v34 = vld [vmem:[%s4252_s3 + $0x20] ss:$8 sps:$4 sm:$0xff]  }
 0x1f8   : > { %2977 = vmatprep.subr.bf16.mxu1 %v3431_v51 }
 0x1fb   : > { %2978 = vmatpush3.bf16.msra.mxu1 %v3208_v35  ;;  %v3250_v35 = vld [vmem:[%s4252_s3 + $0x34] ss:$8 sps:$4 sm:$0xff]  }
 0x1fc   : > { %2979 = vmatprep.subr.bf16.mxu1 %v3431_v51 }
 0x1ff   : > { %2980 = vmatpush3.bf16.msra.mxu1 %v3209_v37  ;;  %v3253_v37 = vld [vmem:[%s4252_s3 + $0x44] ss:$8 sps:$4 sm:$0xff]  }
 0x200   : > { %2981 = vmatprep.subr.bf16.mxu1 %v3431_v51 }
 0x203   : > { %2982 = vmatpush3.bf16.msra.mxu1 %v3210_v42  ;;  %v3254_v42 = vld [vmem:[%s4252_s3 + $0x50] ss:$8 sps:$4 sm:$0xff]  }
 0x204   : > { %2983 = vmatprep.subr.bf16.mxu1 %v3431_v51 }
 0x207   : > { %2984 = vmatpush3.bf16.msra.mxu1 %v3211_v47 }
 0x208   : > { %2989 = vmatprep.subr.bf16.mxu1 %v3431_v51 }
 0x20a   : > { %2986 = vmatmul.mubr.bf16.vlgmr.msra.gmra.mrb[0].mxu1 %v1088_v50 }
 0x20b   : > { %3005 = vmatprep.mubr.msk.bf16.mxu1 %vm3432_vm5, %v3431_v51  ;;  %2990 = vmatpush3.bf16.msra.mxu1 %v3289_v4  ;;  %v3281_v4 = vld [vmem:[%s4252_s3 + $0x154] ss:$8 sps:$4 sm:$0xff]  }
 0x20c   : > { %2991 = vmatprep.subr.bf16.mxu1 %v3431_v51 }
 0x20f   : > { %2992 = vmatpush3.bf16.msra.mxu1 %v3290_v5 }
 0x210   : > { %2993 = vmatprep.subr.bf16.mxu1 %v3431_v51 }
 0x2dd   : > { %v1172_v6 = vpop.f32.mrb[0].mxu1 }
 0x2de   : > { %v1181_v8 = vadd.f32 %v1172_v6, %v3709_v56  ;;  %v2987_v9 = vpop.f32.mrb[1].mxu1  ;;  %v3279_v6 = vld [vmem:[%s4252_s3 + $0x150] ss:$8 sps:$4 sm:$0xff]  }
 0x2df   : > { %v1175_v10 = vpop.f32.mrb[2].mxu1 }
 0x2e0   : > { %vm1183_vm8 = vcmp.gt.f32.partialorder %v1181_v8, 0.0  ;;  %v1186_v11 = vmul.f32 %v1185_v7, %v1181_v8  ;;  %v1182_v12 = vadd.f32 %v1175_v10, %v3711_v60  ;;  %v2988_v13 = vpop.f32.mrb[3].mxu1 }
 0x2e1   : > { %v3287_v13 = vld [vmem:[%s4252_s3 + $0x174] ss:$8 sps:$4 sm:$0xff]  }
 0x2e2   : > { %v1188_v14 = vsel %vm1183_vm8, %v1181_v8, %v1186_v11  ;;  %vm1184_vm9 = vcmp.gt.f32.partialorder %v1182_v12, 0.0  ;;  %v1187_v15 = vmul.f32 %v1185_v7, %v1182_v12  ;;  %v3284_v7 = vld [vmem:[%s4252_s3 + $0x164] ss:$8 sps:$4 sm:$0xff]  }
 0x2e3   : > { %v2867_v16 = vpack.c.bf16 %v1188_v14, %v1188_v14 }
 0x2e4   : > { %v1189_v17 = vsel %vm1184_vm9, %v1182_v12, %v1187_v15  ;;  %v3282_v12 = vld [vmem:[%s4252_s3 + $0x160] ss:$8 sps:$4 sm:$0xff]  }
 0x2e5   : > { %v1196_v18 = vrot.slane %v2867_v16, 7  ;;  %v2868_v19 = vpack.c.bf16 %v1189_v17, %v1189_v17 }
 0x2e7   : > { %v1197_v20 = vrot.slane %v1196_v18, 4  ;;  %1204 = vst [vmem:[#allocation3] sm:$0xe] %v1196_v18  ;;  %v1198_v21 = vrot.slane %v2868_v19, 7  ;;  %v3285_v18 = vld [vmem:[%s4252_s3 + $0x170] ss:$8 sps:$4 sm:$0xff]  }
 0x2e9   : > { %v1199_v56 = vsel %vm3570_vm4, %v1197_v20, %v1198_v21  ;;  %v1200_v22 = vrot.slane %v1198_v21, 4 }
 0x2ea   : > { %1205 = vst [vmem:[#allocation3 + $0x4] sm:$0xf] %v1199_v56  ;;  %v3291_v56 = vld [vmem:[%s4253_s4 + $0x50] sm:$0xff]  }
 0x2eb   : > { %1206 = vst [vmem:[#allocation3 + $0x8] sm:$0x1] %v1200_v22  ;;  %2994 = vmatpush3.bf16.msra.mxu1 %v3291_v56  ;;  %v3292_v22 = vld [vmem:[%s4253_s4 + $0x58] sm:$0xff]  }
 0x2ec   : > { %2995 = vmatprep.subr.bf16.mxu1 %v3431_v51  ;;  %v3315_v56 = vld [vmem:[%s4253_s4 + $0xb8] sm:$0xff]  }
 0x2ee   : > { %v1226_v24 = vld [vmem:[#allocation3] sm:$0xe] }
 0x2ef   : > { %v1207_v40 = vld [vmem:[#allocation3] sm:$0xf]  ;;  %2996 = vmatpush3.bf16.msra.mxu1 %v3292_v22 }
 0x2f0   : > { %2997 = vmatprep.subr.bf16.mxu1 %v3431_v51 }
 0x2f1   : > { %v1208_v23 = vld [vmem:[#allocation3 + $0x4] sm:$0xf] }
 0x2f2   : > { %v3844_v60 = vcombine.low %v1226_v24, %v1208_v23  ;;  %v3241_v25 = vld [vmem:[#allocation3 + $0x8] ss:$0 sps:$4 sm:$0x11]   ;;  %v2691_v41 = vcombine.low %v1207_v40, %v1208_v23  ;;  %v3293_v23 = vld [vmem:[%s4253_s4 + $0x60] sm:$0xff]   ;;  %v3294_v24 = vld [vmem:[%s4253_s4 + $0x68] sm:$0xff]  }
 0x2f3   : > { %v1253_v29 = vrot.slane %v3241_v25, 1  ;;  %v1390_v50 = vshll.u32 %v3241_v25, 16  ;;  %v3288_v5 = vld [vmem:[#allocation3 + $0x8] ss:$0 sps:$4 sm:$0x33]   ;;  %2998 = vmatpush3.bf16.msra.mxu1 %v3293_v23  ;;  %v3296_v25 = vld [vmem:[%s4253_s4 + $0x78] sm:$0xff]  }
 0x2f4   : > { %v1252_v27 = vrot.slane %v3844_v60, 1  ;;  %v1385_v44 = vshll.u32 %v2691_v41, 16  ;;  %v1383_v49 = vshrl.u32 %v2691_v41, 16  ;;  %v1540_v8 = vshrl.u32 %v3844_v60, 16  ;;  %2999 = vmatprep.subr.bf16.mxu1 %v3431_v51 }
 0x2f5   : > { %v1392_v54 = vrot.slane %v1390_v50, 1  ;;  %v1543_v9 = vshll.u32 %v3844_v60, 16  ;;  %v1548_v10 = vshrl.u32 %v3288_v5, 16  ;;  %v1551_v11 = vshll.u32 %v3288_v5, 16  ;;  %v3295_v60 = vld [vmem:[%s4253_s4 + $0x70] sm:$0xff]   ;;  %v3308_v5 = vld [vmem:[%s4253_s4 + $0x80] sm:$0xff]  }
 0x2f6   : > { %v1254_v31 = vsel %vm470_vm0, %v1252_v27, %v1253_v29  ;;  %v1387_v47 = vrot.slane %v1385_v44, 1  ;;  %v1542_v14 = vrot.slane %v1540_v8, 1  ;;  %v3310_v8 = vld [vmem:[%s4253_s4 + $0x90] sm:$0xff]  }
 0x2f7   : > { %1369 = vmatmul.mubr.bf16.vlgmr.msra.gmra.mrb[4].mxu0 %v1254_v31  ;;  %v1545_v15 = vrot.slane %v1543_v9, 2  ;;  %v1550_v16 = vrot.slane %v1548_v10, 1  ;;  %v1553_v17 = vrot.slane %v1551_v11, 2  ;;  %3000 = vmatpush3.bf16.msra.mxu1 %v3294_v24  ;;  %v3311_v9 = vld [vmem:[%s4253_s4 + $0x98] sm:$0xff]   ;;  %v3312_v10 = vld [vmem:[%s4253_s4 + $0xa0] sm:$0xff]  }
 0x2f8   : > { %1476 = vmatpush1.bf16.msra.mxu0 %v3237_v26  ;;  %1507 = vmatprep.mubr.bf16.mxu0 %v3427_v0  ;;  %v1388_v53 = vor.u32 %v1387_v47, %v1383_v49  ;;  %v1686_v26 = vstv %s2530_s10  ;;  %v3299_v49 = vld [vmem:[%s4253_s4] sm:$0xff]  }
 0x2f9   : > { %1477 = vmatprep.subr.bf16.mxu0 %v3244_v30  ;;  %v1546_v19 = vor.u32 %v1545_v15, %v1542_v14  ;;  %v1554_v20 = vor.u32 %v1553_v17, %v1550_v16  ;;  %3001 = vmatprep.subr.bf16.mxu1 %v3431_v51  ;;  %v3314_v17 = vld [vmem:[%s4253_s4 + $0xb0] sm:$0xff]  }
 0x2fa   : > { %v1393_v58 = vsel %vm564_vm2, %v1388_v53, %v1392_v54  ;;  %v3302_v53 = vld [vmem:[%s4253_s4 + $0x18] sm:$0xff]   ;;  %v3303_v54 = vld [vmem:[%s4253_s4 + $0x20] sm:$0xff]  }
 0x2fb   : > { %v1555_v21 = vsel %vm676_vm3, %v1546_v19, %v1554_v20  ;;  %3002 = vmatpush3.bf16.msra.mxu1 %v3295_v60  ;;  %v3317_v60 = vld [vmem:[%s4254_s5] sm:$0xff]  }
 0x2fc   : > { %1478 = vmatpush1.bf16.msra.mxu0 %v3242_v32  ;;  %3003 = vmatprep.subr.bf16.mxu1 %v3431_v51 }
 0x2fd   : > { %1479 = vmatprep.subr.bf16.mxu0 %v3247_v33 }
 0x2ff   : > { %3004 = vmatpush3.bf16.msra.mxu1 %v3296_v25 }
 0x300   : > { %1480 = vmatpush1.bf16.msra.mxu0 %v3245_v34  ;;  %3009 = vmatprep.subr.bf16.mxu1 %v3431_v51 }
 0x301   : > { %1481 = vmatprep.subr.bf16.mxu0 %v3250_v35 }
 0x304   : > { %1482 = vmatpush1.bf16.msra.mxu0 %v3248_v36 }
 0x305   : > { %1483 = vmatprep.subr.bf16.mxu0 %v3253_v37 }
 0x308   : > { %1484 = vmatpush1.bf16.msra.mxu0 %v3251_v38 }
 0x309   : > { %1485 = vmatprep.subr.bf16.mxu0 %v3256_v39 }
 0x30c   : > { %1486 = vmatpush1.bf16.msra.mxu0 %v3254_v42 }
 0x30d   : > { %1487 = vmatprep.subr.bf16.mxu0 %v3259_v43 }
 0x310   : > { %1488 = vmatpush1.bf16.msra.mxu0 %v3257_v45 }
 0x311   : > { %1489 = vmatprep.subr.bf16.mxu0 %v3262_v46 }
 0x314   : > { %1490 = vmatpush1.bf16.msra.mxu0 %v3260_v48 }
 0x315   : > { %1637 = vmatprep.subr.bf16.mxu0 %v3266_v52  ;;  %v3301_v52 = vld [vmem:[%s4253_s4 + $0x10] sm:$0xff]  }
 0x317   : > { %1508 = vmatmul.mubr.bf16.vlgmr.msra.gmra.mrb[4].mxu0 %v1393_v58  ;;  %v3304_v58 = vld [vmem:[%s4253_s4 + $0x28] sm:$0xff]  }
 0x318   : > { %1638 = vmatpush1.bf16.msra.mxu0 %v3264_v55  ;;  %1669 = vmatprep.mubr.bf16.mxu0 %v3427_v0 }
 0x319   : > { %1639 = vmatprep.subr.bf16.mxu0 %v3269_v57 }
 0x31c   : > { %1640 = vmatpush1.bf16.msra.mxu0 %v3267_v59 }
 0x31d   : > { %1641 = vmatprep.subr.bf16.mxu0 %v3272_v61  ;;  %v3305_v61 = vld [vmem:[%s4253_s4 + $0x30] sm:$0xff]  }
 0x320   : > { %1642 = vmatpush1.bf16.msra.mxu0 %v3270_v62 }
 0x321   : > { %1643 = vmatprep.subr.bf16.mxu0 %v3275_v63  ;;  %v3306_v63 = vld [vmem:[%s4253_s4 + $0x38] sm:$0xff]  }
 0x324   : > { %1644 = vmatpush1.bf16.msra.mxu0 %v3273_v1 }
 0x325   : > { %1645 = vmatprep.subr.bf16.mxu0 %v3278_v2 }
 0x328   : > { %1646 = vmatpush1.bf16.msra.mxu0 %v3276_v3 }
 0x329   : > { %1647 = vmatprep.subr.bf16.mxu0 %v3281_v4 }
 0x32c   : > { %1648 = vmatpush1.bf16.msra.mxu0 %v3279_v6 }
 0x32d   : > { %1649 = vmatprep.subr.bf16.mxu0 %v3284_v7  ;;  %v3309_v7 = vld [vmem:[%s4253_s4 + $0x88] sm:$0xff]  }
 0x330   : > { %1650 = vmatpush1.bf16.msra.mxu0 %v3282_v12  ;;  %v3313_v12 = vld [vmem:[%s4253_s4 + $0xa8] sm:$0xff]  }
 0x331   : > { %1651 = vmatprep.subr.bf16.mxu0 %v3287_v13 }
 0x334   : > { %1652 = vmatpush1.bf16.msra.mxu0 %v3285_v18 }
 0x337   : > { %1670 = vmatmul.mubr.bf16.vlgmr.msra.gmra.mrb[4].mxu0 %v1555_v21 }
 0x40a   : > { %v1671_v27 = vpop.f32.mrb[4].mxu0 }
 0x40b   : > { %vm1684_vm10 = vcmp.gt.f32.partialorder %v1671_v27, 0.0  ;;  %v1687_v29 = vmul.f32 %v1686_v26, %v1671_v27  ;;  %v3971_v30 = vpop.f32.mrb[5].mxu0 }
 0x40c   : > { %v1675_v31 = vpop.f32.mrb[6].mxu0 }
 0x40d   : > { %v1689_v32 = vsel %vm1684_vm10, %v1671_v27, %v1687_v29  ;;  %vm1685_vm11 = vcmp.gt.f32.partialorder %v1675_v31, 0.0  ;;  %v1688_v33 = vmul.f32 %v1686_v26, %v1675_v31  ;;  %v3973_v34 = vpop.f32.mrb[7].mxu0  ;;  %v2085_v26 = vstv %s2531_s26  ;;  %s2526_s26 = sshll.u32 %s310_s17, 8 }
 0x40e   : > { %v2869_v35 = vpack.c.bf16 %v1689_v32, %v1689_v32  ;;  %s4115_s10 = scalar_lea.vmem [#allocation7], %s2526_s26  ;;  %s3364_s26 = scalar_lea.vmem %s3363_s24, 8192 }
 0x40f   : > { %v1690_v36 = vsel %vm1685_vm11, %v1675_v31, %v1688_v33  ;;  %s2446_s19 = sshll.u32 %s4115_s10, 4  ;;  %s4200_s19 = int_to_ptr.vmem [resolvable:$true] %s2446_s19 }
 0x410   : > { %v1697_v37 = vrot.slane %v2869_v35, 7  ;;  %v2870_v38 = vpack.c.bf16 %v1690_v36, %v1690_v36  ;;  %s3358_s22 = scalar_lea.vmem %s4200_s19, 4096  ;;  %p3365_p13 = scmp.lt.s32.totalorder %s4200_s19, %s3363_s24 }
 0x411   : > { %p3359_p9 = scmp.ne.s32.totalorder %s4200_s19, %s3358_s22  ;;  %p3366_p0 = scmp.lt.s32.totalorder %s3364_s26, %s3358_s22 }
 0x412   : > { %v1698_v39 = vrot.slane %v1697_v37, 4  ;;  %1705 = vst [vmem:[#allocation3] sm:$0xe] %v1697_v37  ;;  %v1699_v40 = vrot.slane %v2870_v38, 7 }
 0x413   : > { %p3360_p10 = pnand %p3359_p9, %p3521_p5  ;;  %p3367_p1 = por %p3366_p0, %p3365_p13 }
 0x414   : > { %v1700_v41 = vsel %vm3570_vm4, %v1698_v39, %v1699_v40  ;;  %v1701_v42 = vrot.slane %v1699_v40, 4  ;;  %vm2105_vm4 = vcmask 130048   ;;  %v3321_v39 = vld [vmem:[%s4255_s6 + $0x4] ss:$8 sps:$4 sm:$0xff]   ;;  %v3324_v40 = vld [vmem:[%s4255_s6 + $0x14] ss:$8 sps:$4 sm:$0xff]  }
 0x415   : > { %1706 = vst [vmem:[#allocation3 + $0x4] sm:$0xf] %v1700_v41  ;;  %3051 = vmatprep.mubr.msk.bf16.mxu0 %vm2105_vm4, %v3317_v60  ;;  %v3322_v41 = vld [vmem:[%s4255_s6 + $0x10] ss:$8 sps:$4 sm:$0xff]   ;;  %p3361_p12 = pneg %p3360_p10 }
 0x416   : > { %1707 = vst [vmem:[#allocation3 + $0x8] sm:$0x1] %v1701_v42  ;;  %v3327_v42 = vld [vmem:[%s4255_s6 + $0x24] ss:$8 sps:$4 sm:$0xff]  }
 0x417   : > { %p3368_p2 = pnand %p3367_p1, %p3361_p12 }
 0x419   : > { %v1727_v44 = vld [vmem:[#allocation3] sm:$0xe] }
 0x41a   : > { %v1708_v55 = vld [vmem:[#allocation3] sm:$0xf] }
 0x41c   : > { %v1709_v43 = vld [vmem:[#allocation3 + $0x4] sm:$0xf] }
 0x41d   : > { %v3977_v45 = vcombine.low %v1727_v44, %v1709_v43  ;;  %v3298_v46 = vld [vmem:[#allocation3 + $0x8] ss:$0 sps:$4 sm:$0x11]   ;;  %v2769_v57 = vcombine.low %v1708_v55, %v1709_v43  ;;  %v3325_v43 = vld [vmem:[%s4255_s6 + $0x20] ss:$8 sps:$4 sm:$0xff]  }
 0x41e   : > { %v1754_v48 = vrot.slane %v3298_v46, 1  ;;  %v1857_v2 = vshll.u32 %v3298_v46, 16  ;;  %v3316_v11 = vld [vmem:[#allocation3 + $0x8] ss:$0 sps:$4 sm:$0x33]  }
 0x41f   : > { %v1753_v47 = vrot.slane %v3977_v45, 1  ;;  %v1852_v59 = vshll.u32 %v2769_v57, 16  ;;  %v1850_v1 = vshrl.u32 %v2769_v57, 16  ;;  %v1973_v13 = vshrl.u32 %v3977_v45, 16  ;;  %v3330_v44 = vld [vmem:[%s4255_s6 + $0x34] ss:$8 sps:$4 sm:$0xff]  }
 0x420   : > { %v1859_v4 = vrot.slane %v1857_v2, 1  ;;  %v1976_v14 = vshll.u32 %v3977_v45, 16  ;;  %v1981_v15 = vshrl.u32 %v3316_v11, 16  ;;  %v1984_v16 = vshll.u32 %v3316_v11, 16  ;;  %v3328_v45 = vld [vmem:[%s4255_s6 + $0x30] ss:$8 sps:$4 sm:$0xff]  }
 0x421   : > { %v1755_v50 = vsel %vm470_vm0, %v1753_v47, %v1754_v48  ;;  %v1854_v62 = vrot.slane %v1852_v59, 1  ;;  %v1975_v18 = vrot.slane %v1973_v13, 1  ;;  %v3333_v46 = vld [vmem:[%s4255_s6 + $0x44] ss:$8 sps:$4 sm:$0xff]   ;;  %v3331_v47 = vld [vmem:[%s4255_s6 + $0x40] ss:$8 sps:$4 sm:$0xff]  }
 0x422   : > { %3006 = vmatmul.mubr.bf16.vlgmr.msra.gmra.mrb[4].mxu1 %v1755_v50  ;;  %v1978_v19 = vrot.slane %v1976_v14, 2  ;;  %v1983_v20 = vrot.slane %v1981_v15, 1  ;;  %v1986_v21 = vrot.slane %v1984_v16, 2  ;;  %v3336_v48 = vld [vmem:[%s4255_s6 + $0x54] ss:$8 sps:$4 sm:$0xff]  }
 0x423   : > { %3010 = vmatpush3.bf16.msra.mxu1 %v3299_v49  ;;  %3025 = vmatprep.mubr.msk.bf16.mxu1 %vm3432_vm5, %v3431_v51  ;;  %v1855_v3 = vor.u32 %v1854_v62, %v1850_v1  ;;  %v3334_v49 = vld [vmem:[%s4255_s6 + $0x50] ss:$8 sps:$4 sm:$0xff]   ;;  %v3339_v50 = vld [vmem:[%s4255_s6 + $0x64] ss:$8 sps:$4 sm:$0xff]  }
 0x424   : > { %3011 = vmatprep.subr.bf16.mxu1 %v3431_v51  ;;  %v1979_v22 = vor.u32 %v1978_v19, %v1975_v18  ;;  %v1987_v23 = vor.u32 %v1986_v21, %v1983_v20 }
 0x425   : > { %v1860_v6 = vsel %vm564_vm2, %v1855_v3, %v1859_v4 }
 0x426   : > { %v1988_v24 = vsel %vm676_vm3, %v1979_v22, %v1987_v23 }
 0x427   : > { %3012 = vmatpush3.bf16.msra.mxu1 %v3300_v28  ;;  %v3337_v28 = vld [vmem:[%s4255_s6 + $0x60] ss:$8 sps:$4 sm:$0xff]  }
 0x428   : > { %3013 = vmatprep.subr.bf16.mxu1 %v3431_v51 }
 0x42b   : > { %3014 = vmatpush3.bf16.msra.mxu1 %v3301_v52  ;;  %v3342_v52 = vld [vmem:[%s4255_s6 + $0x74] ss:$8 sps:$4 sm:$0xff]  }
 0x42c   : > { %3015 = vmatprep.subr.bf16.mxu1 %v3431_v51 }
 0x42f   : > { %3016 = vmatpush3.bf16.msra.mxu1 %v3302_v53  ;;  %v3340_v53 = vld [vmem:[%s4255_s6 + $0x70] ss:$8 sps:$4 sm:$0xff]  }
 0x430   : > { %3017 = vmatprep.subr.bf16.mxu1 %v3431_v51 }
 0x433   : > { %3018 = vmatpush3.bf16.msra.mxu1 %v3303_v54 }
 0x434   : > { %3019 = vmatprep.subr.bf16.mxu1 %v3431_v51 }
 0x437   : > { %3020 = vmatpush3.bf16.msra.mxu1 %v3304_v58 }
 0x438   : > { %3021 = vmatprep.subr.bf16.mxu1 %v3431_v51 }
 0x43b   : > { %3022 = vmatpush3.bf16.msra.mxu1 %v3305_v61 }
 0x43c   : > { %3023 = vmatprep.subr.bf16.mxu1 %v3431_v51 }
 0x43f   : > { %3024 = vmatpush3.bf16.msra.mxu1 %v3306_v63 }
 0x440   : > { %3029 = vmatprep.subr.bf16.mxu1 %v3431_v51 }
 0x442   : > { %3026 = vmatmul.mubr.bf16.vlgmr.msra.gmra.mrb[4].mxu1 %v1860_v6 }
 0x443   : > { %3030 = vmatpush3.bf16.msra.mxu1 %v3308_v5  ;;  %3045 = vmatprep.mubr.msk.bf16.mxu1 %vm3432_vm5, %v3431_v51 }
 0x444   : > { %3031 = vmatprep.subr.bf16.mxu1 %v3431_v51 }
 0x447   : > { %3032 = vmatpush3.bf16.msra.mxu1 %v3309_v7 }
 0x448   : > { %3033 = vmatprep.subr.bf16.mxu1 %v3431_v51 }
 0x44b   : > { %3034 = vmatpush3.bf16.msra.mxu1 %v3310_v8 }
 0x44c   : > { %3035 = vmatprep.subr.bf16.mxu1 %v3431_v51 }
 0x44f   : > { %3036 = vmatpush3.bf16.msra.mxu1 %v3311_v9 }
 0x450   : > { %3037 = vmatprep.subr.bf16.mxu1 %v3431_v51 }
 0x453   : > { %3038 = vmatpush3.bf16.msra.mxu1 %v3312_v10 }
 0x454   : > { %3039 = vmatprep.subr.bf16.mxu1 %v3431_v51 }
 0x457   : > { %3040 = vmatpush3.bf16.msra.mxu1 %v3313_v12 }
 0x458   : > { %3041 = vmatprep.subr.bf16.mxu1 %v3431_v51 }
 0x45b   : > { %3042 = vmatpush3.bf16.msra.mxu1 %v3314_v17 }
 0x45c   : > { %3043 = vmatprep.subr.bf16.mxu1 %v3431_v51 }
 0x45f   : > { %3044 = vmatpush3.bf16.msra.mxu1 %v3315_v56 }
 0x462   : > { %3046 = vmatmul.mubr.bf16.vlgmr.msra.gmra.mrb[4].mxu1 %v1988_v24 }
 0x535   : > { %v2072_v25 = vpop.f32.mrb[4].mxu1 }
 0x536   : > { %v2081_v27 = vadd.f32 %v2072_v25, %v3971_v30  ;;  %v3047_v29 = vpop.f32.mrb[5].mxu1  ;;  %v3318_v30 = vld [vmem:[%s4254_s5 + $0x8] sm:$0xff]  }
 0x537   : > { %v2075_v51 = vpop.f32.mrb[6].mxu1 }
 0x538   : > { %v2086_v31 = vmul.f32 %v2085_v26, %v2081_v27  ;;  %v2082_v32 = vadd.f32 %v2075_v51, %v3973_v34  ;;  %v3048_v33 = vpop.f32.mrb[7].mxu1  ;;  %vm2083_vm12 = vcmp.gt.f32.partialorder %v2081_v27, 0.0  ;;  %v3319_v34 = vld [vmem:[%s4255_s6] ss:$8 sps:$4 sm:$0xff]  }
 0x53a   : > { %vm2084_vm13 = vcmp.gt.f32.partialorder %v2082_v32, 0.0  ;;  %v2087_v35 = vmul.f32 %v2085_v26, %v2082_v32  ;;  %v2088_v36 = vsel %vm2083_vm12, %v2081_v27, %v2086_v31 }
 0x53c   : > { %v2089_v37 = vsel %vm2084_vm13, %v2082_v32, %v2087_v35 }
 0x53d   : > { %v2094_v38 = vpack.c.bf16 %v2089_v37, %v2088_v36 }
 0x53f   : > { %3049 = vmatprep.subr.bf16.mxu0 %v2094_v38 }
 0x540   : > { %3050 = vmatpush3.bf16.msra.mxu0 %v2094_v38 }
 0x541   : > { %2259 = vmatprep.subr.bf16.mxu0 %v3321_v39 }
 0x543   : > { %3052 = vmatmul.mubr.msk.bf16.vlgmr.msra.gmra.mrb[8].mxu0 %vm2105_vm4, %v3318_v30 }
 0x544   : > { %2260 = vmatpush1.bf16.msra.mxu0 %v3319_v34  ;;  %2291 = vmatprep.mubr.bf16.mxu0 %v3427_v0 }
 0x545   : > { %2261 = vmatprep.subr.bf16.mxu0 %v3324_v40 }
 0x548   : > { %2262 = vmatpush1.bf16.msra.mxu0 %v3322_v41 }
 0x549   : > { %2263 = vmatprep.subr.bf16.mxu0 %v3327_v42 }
 0x54c   : > { %2264 = vmatpush1.bf16.msra.mxu0 %v3325_v43 }
 0x54d   : > { %2265 = vmatprep.subr.bf16.mxu0 %v3330_v44 }
 0x550   : > { %2266 = vmatpush1.bf16.msra.mxu0 %v3328_v45 }
 0x551   : > { %2267 = vmatprep.subr.bf16.mxu0 %v3333_v46 }
 0x554   : > { %2268 = vmatpush1.bf16.msra.mxu0 %v3331_v47 }
 0x555   : > { %2269 = vmatprep.subr.bf16.mxu0 %v3336_v48 }
 0x558   : > { %2270 = vmatpush1.bf16.msra.mxu0 %v3334_v49 }
 0x559   : > { %2271 = vmatprep.subr.bf16.mxu0 %v3339_v50 }
 0x55c   : > { %2272 = vmatpush1.bf16.msra.mxu0 %v3337_v28 }
 0x55d   : > { %2273 = vmatprep.subr.bf16.mxu0 %v3342_v52 }
 0x560   : > { %2274 = vmatpush1.bf16.msra.mxu0 %v3340_v53 }
 0x616   : > { %v3053_v54 = vpop.f32.mrb[8].mxu0 }
 0x617   : > { %v2146_v55 = vpop.f32.mrb[9].mxu0 }
 0x618   : > { %v3054_v57 = vpop.f32.mrb[10].mxu0 }
 0x619   : > { %v2162_v58 = vpack.c.bf16 %v3054_v57, %v3053_v54  ;;  %v2149_v59 = vpop.f32.mrb[11].mxu0 }
 0x61a   : > { %v2161_v61 = vpack.c.bf16 %v2149_v59, %v2146_v55 }
 0x61c   : > { %2292 = vmatmul.mubr.bf16.vlgmr.msra.gmra.mrb[12].mxu0 %v2161_v61 }
 0x61d   : > { %2301 = vmatprep.mubr.bf16.mxu0 %v3427_v0 }
 0x624   : > { %2302 = vmatmul.mubr.bf16.gmra.mrb[16].mxu0 %v2162_v58 }
 0x6ef   : > { %v2293_v62 = vpop.f32.mrb[12].mxu0 }
 0x6f0   : > { %2313 = vst.msk [vmem:[%s4115_s10] sm:$0xff] %vm2312_vm14, %v2293_v62  ;;  %2321 = vrot.lane.b32.xlu1 %v2293_v62, %s3433_s12  ;;  %v2295_v0 = vpop.f32.mrb[13].mxu0 }
 0x6f1   : > { %2835 = vst.msk [vmem:[%s4115_s10 + $0x80] sm:$0xff] %vm2312_vm14, %v2295_v0  ;;  %v2297_v63 = vpop.f32.mrb[14].mxu0 }
 0x6f2   : > { %2314 = vst.msk [vmem:[%s4115_s10 + $0x8] sm:$0xff] %vm2312_vm14, %v2297_v63  ;;  %2323 = vrot.lane.b32.xlu0 %v2297_v63, %s3433_s12  ;;  %v2299_v1 = vpop.f32.mrb[15].mxu0 }
 0x6f3   : > { %2836 = vst.msk [vmem:[%s4115_s10 + $0x88] sm:$0xff] %vm2312_vm14, %v2299_v1 }
 0x6f4   : > { %2338 = vrot.lane.b32.xlu1 %v2293_v62, %s3434_s13 }
 0x6f6   : > { %2340 = vrot.lane.b32.xlu0 %v2297_v63, %s3434_s13 }
 0x6f7   : > { %v2303_v2 = vpop.f32.mrb[16].mxu0 }
 0x6f8   : > { %2315 = vst.msk [vmem:[%s4115_s10 + $0x10] sm:$0xff] %vm2312_vm14, %v2303_v2  ;;  %2355 = vrot.lane.b32.xlu1 %v2293_v62, %s3429_s18  ;;  %v2305_v3 = vpop.f32.mrb[17].mxu0 }
 0x6f9   : > { %2837 = vst.msk [vmem:[%s4115_s10 + $0x90] sm:$0xff] %vm2312_vm14, %v2305_v3  ;;  %v2307_v4 = vpop.f32.mrb[18].mxu0 }
 0x6fa   : > { %2316 = vst.msk [vmem:[%s4115_s10 + $0x18] sm:$0xff] %vm2312_vm14, %v2307_v4  ;;  %2357 = vrot.lane.b32.xlu0 %v2297_v63, %s3429_s18  ;;  %v2309_v5 = vpop.f32.mrb[19].mxu0 }
 0x6fb   : > { %2838 = vst.msk [vmem:[%s4115_s10 + $0x98] sm:$0xff] %vm2312_vm14, %v2309_v5 }
 0x6fc   : > { %2381 = vrot.lane.b32.xlu1 %v2295_v0, %s3433_s12 }
 0x6fe   : > { %2383 = vrot.lane.b32.xlu0 %v2299_v1, %s3433_s12 }
 0x700   : > { %2398 = vrot.lane.b32.xlu1 %v2295_v0, %s3434_s13 }
 0x702   : > { %2400 = vrot.lane.b32.xlu0 %v2299_v1, %s3434_s13 }
 0x704   : > { %2415 = vrot.lane.b32.xlu1 %v2295_v0, %s3429_s18 }
 0x706   : > { %2417 = vrot.lane.b32.xlu0 %v2299_v1, %s3429_s18 }
 0x708   : > { %2325 = vrot.lane.b32.xlu1 %v2303_v2, %s3433_s12 }
 0x70a   : > { %2327 = vrot.lane.b32.xlu0 %v2307_v4, %s3433_s12 }
 0x70c   : > { %2342 = vrot.lane.b32.xlu1 %v2303_v2, %s3434_s13 }
 0x70e   : > { %2344 = vrot.lane.b32.xlu0 %v2307_v4, %s3434_s13 }
 0x710   : > { %2359 = vrot.lane.b32.xlu1 %v2303_v2, %s3429_s18 }
 0x712   : > { %2361 = vrot.lane.b32.xlu0 %v2307_v4, %s3429_s18 }
 0x714   : > { %2385 = vrot.lane.b32.xlu1 %v2305_v3, %s3433_s12 }
 0x716   : > { %2387 = vrot.lane.b32.xlu0 %v2309_v5, %s3433_s12 }
 0x718   : > { %2402 = vrot.lane.b32.xlu1 %v2305_v3, %s3434_s13 }
 0x71a   : > { %2404 = vrot.lane.b32.xlu0 %v2309_v5, %s3434_s13 }
 0x71c   : > { %2419 = vrot.lane.b32.xlu1 %v2305_v3, %s3429_s18 }
 0x71e   : > { %2421 = vrot.lane.b32.xlu0 %v2309_v5, %s3429_s18  ;;  %s2871_s18 = sshll.u32 %s3504_s9, 12  ;;  %s4208_s9 = scalar_lea.sflag [#allocation5], %s310_s17 }
 0x71f   : > { %s4198_s21 = scalar_lea.hbm %s4257_s8, %s2871_s18 }
 0x762   : > { %v2322_v6 = vpop.permute.xlu1 %2321 }
 0x763   : > { %2823 = vst.msk [vmem:[%s4115_s10 + $0x20] sm:$0xff] %vm2312_vm14, %v2322_v6 }
 0x764   : > { %v2324_v7 = vpop.permute.xlu0 %2323 }
 0x765   : > { %2824 = vst.msk [vmem:[%s4115_s10 + $0x28] sm:$0xff] %vm2312_vm14, %v2324_v7 }
 0x766   : > { %v2339_v8 = vpop.permute.xlu1 %2338 }
 0x767   : > { %2827 = vst.msk [vmem:[%s4115_s10 + $0x40] sm:$0xff] %vm2312_vm14, %v2339_v8 }
 0x768   : > { %v2341_v9 = vpop.permute.xlu0 %2340 }
 0x769   : > { %2828 = vst.msk [vmem:[%s4115_s10 + $0x48] sm:$0xff] %vm2312_vm14, %v2341_v9 }
 0x76a   : > { %v2356_v10 = vpop.permute.xlu1 %2355 }
 0x76b   : > { %2831 = vst.msk [vmem:[%s4115_s10 + $0x60] sm:$0xff] %vm2312_vm14, %v2356_v10 }
 0x76c   : > { %v2358_v11 = vpop.permute.xlu0 %2357 }
 0x76d   : > { %2832 = vst.msk [vmem:[%s4115_s10 + $0x68] sm:$0xff] %vm2312_vm14, %v2358_v11 }
 0x76e   : > { %v2382_v12 = vpop.permute.xlu1 %2381 }
 0x76f   : > { %2839 = vst.msk [vmem:[%s4115_s10 + $0xa0] sm:$0xff] %vm2312_vm14, %v2382_v12 }
 0x770   : > { %v2384_v13 = vpop.permute.xlu0 %2383 }
 0x771   : > { %2840 = vst.msk [vmem:[%s4115_s10 + $0xa8] sm:$0xff] %vm2312_vm14, %v2384_v13 }
 0x772   : > { %v2399_v14 = vpop.permute.xlu1 %2398 }
 0x773   : > { %2843 = vst.msk [vmem:[%s4115_s10 + $0xc0] sm:$0xff] %vm2312_vm14, %v2399_v14 }
 0x774   : > { %v2401_v15 = vpop.permute.xlu0 %2400 }
 0x775   : > { %2844 = vst.msk [vmem:[%s4115_s10 + $0xc8] sm:$0xff] %vm2312_vm14, %v2401_v15 }
 0x776   : > { %v2416_v16 = vpop.permute.xlu1 %2415 }
 0x777   : > { %2847 = vst.msk [vmem:[%s4115_s10 + $0xe0] sm:$0xff] %vm2312_vm14, %v2416_v16 }
 0x778   : > { %v2418_v17 = vpop.permute.xlu0 %2417 }
 0x779   : > { %2848 = vst.msk [vmem:[%s4115_s10 + $0xe8] sm:$0xff] %vm2312_vm14, %v2418_v17 }
 0x77a   : > { %v2326_v18 = vpop.permute.xlu1 %2325 }
 0x77b   : > { %2825 = vst.msk [vmem:[%s4115_s10 + $0x30] sm:$0xff] %vm2312_vm14, %v2326_v18 }
 0x77c   : > { %v2328_v19 = vpop.permute.xlu0 %2327 }
 0x77d   : > { %2826 = vst.msk [vmem:[%s4115_s10 + $0x38] sm:$0xff] %vm2312_vm14, %v2328_v19 }
 0x77e   : > { %v2343_v20 = vpop.permute.xlu1 %2342 }
 0x77f   : > { %2829 = vst.msk [vmem:[%s4115_s10 + $0x50] sm:$0xff] %vm2312_vm14, %v2343_v20 }
 0x780   : > { %v2345_v21 = vpop.permute.xlu0 %2344 }
 0x781   : > { %2830 = vst.msk [vmem:[%s4115_s10 + $0x58] sm:$0xff] %vm2312_vm14, %v2345_v21 }
 0x782   : > { %v2360_v56 = vpop.permute.xlu1 %2359 }
 0x783   : > { %2833 = vst.msk [vmem:[%s4115_s10 + $0x70] sm:$0xff] %vm2312_vm14, %v2360_v56 }
 0x784   : > { %v2362_v22 = vpop.permute.xlu0 %2361 }
 0x785   : > { %2834 = vst.msk [vmem:[%s4115_s10 + $0x78] sm:$0xff] %vm2312_vm14, %v2362_v22 }
 0x786   : > { %v2386_v23 = vpop.permute.xlu1 %2385 }
 0x787   : > { %2841 = vst.msk [vmem:[%s4115_s10 + $0xb0] sm:$0xff] %vm2312_vm14, %v2386_v23 }
 0x788   : > { %v2388_v24 = vpop.permute.xlu0 %2387 }
 0x789   : > { %2842 = vst.msk [vmem:[%s4115_s10 + $0xb8] sm:$0xff] %vm2312_vm14, %v2388_v24 }
 0x78a   : > { %v2403_v60 = vpop.permute.xlu1 %2402 }
 0x78b   : > { %2845 = vst.msk [vmem:[%s4115_s10 + $0xd0] sm:$0xff] %vm2312_vm14, %v2403_v60 }
 0x78c   : > { %v2405_v25 = vpop.permute.xlu0 %2404 }
 0x78d   : > { %2846 = vst.msk [vmem:[%s4115_s10 + $0xd8] sm:$0xff] %vm2312_vm14, %v2405_v25 }
 0x78e   : > { %v2420_v26 = vpop.permute.xlu1 %2419 }
 0x78f   : > { %2849 = vst.msk [vmem:[%s4115_s10 + $0xf0] sm:$0xff] %vm2312_vm14, %v2420_v26 }
 0x790   : > { %v2422_v27 = vpop.permute.xlu0 %2421 }
 0x791   : > { %2850 = vst.msk [vmem:[%s4115_s10 + $0xf8] sm:$0xff] %vm2312_vm14, %v2422_v27 }
 0x792   : > { %3371 = shalt.err (!%p3368_p2)
}
 0x793   : > { %s3372_s17 = scalar_lea.hbm %s4198_s21, 4096  ;;  %s3376_s13 = scalar_lea.hbm %s4257_s8, 8192 }
 0x794   : > { %p3373_p3 = scmp.ne.s32.totalorder %s4198_s21, %s3372_s17  ;;  %p3377_p8 = scmp.lt.u32.totalorder %s4198_s21, %s4257_s8 }
 0x795   : > { %p3378_p11 = scmp.lt.u32.totalorder %s3376_s13, %s3372_s17  ;;  %p3380_p10 = scmp.lt.u32.totalorder %s3372_s17, %s4198_s21 }
 0x796   : > { %p3374_p4 = pnand %p3373_p3, %p3521_p5 }
 0x797   : > { %p3379_p9 = por %p3378_p11, %p3377_p8 }
 0x798   : > { %p3375_p7 = pneg %p3374_p4 }
 0x799   : > { %p3381_p12 = por %p3380_p10, %p3379_p9 }
 0x79b   : > { %p3382_p13 = pnand %p3381_p12, %p3375_p7 }
 0x79d   : > { %3385 = shalt.err (!%p3382_p13)
}
 0x79e   : > { %s3436_s20 = smov 128   ;;  %s3437_s22 = smov 8  }
 0x79f   : > { %3091 = dma.vmem_to_hbm [thread:$0]  (%p3521_p5), %s4200_s19, 4096, %s4198_s21, %s4208_s9, %s3436_s20, %s3436_s20, %s3437_s22  }
 0x7a0 PF: > { %p3103_p0 = scmp.ge.s32.totalorder %s3424_s30, 2  ;;  %s2461_s23 = sand.u32 1, %s3412_s27  }
 0x7a1   : > { %s2462_s24 = scalar_lea.sflag [#allocation5], %s2461_s23 }
 0x7a2   : > { %p3098_p1 = pnand %p3103_p0, %p3525_p6 }
 0x7a4   : > { %3407 = dma.done.wait (!%p3098_p1), %s2462_s24, 4096  }
 0x7a5   : > { %3409 = vsyncadd (!%p3098_p1), %s2462_s24, 4294963200  ;;  %p19_p2 = scmp.ge.s32.totalorder %s3508_s11, 4   ;;  %s4263_s27 = smov %s3416_s28 }
 0x7a6   : > { %s4264_s28 = smov %s3420_s29  ;;  %s4265_s29 = smov %s3519_s14 }
 0x7a7   : > { %s4266_s30 = smov %s3508_s11  ;;  %21 = sbr.rel (!%p19_p2) target bundleno = 4 (0x4), region = 110 }
 0x7ae   :  { %2467 = vsyncpa [#allocation5], 1 }
 0x7af   :  { %2469 = vsyncpa [#allocation5 + $0x1], 1 }
 0x7b0   :  { %2470 = vsyncpa [#allocation6], 1 }
 0x7b1   :  { %2472 = vsyncpa [#allocation6 + $0x1], 1 }

</bundles_post_ra>
